<compile_context>
chip_gen: v7x
topology: tpu7x:2x2x1
jax: 0.10.0
libtpu: 0.0.40
codegen_flags: <defaults>
</compile_context>

<pallas_src>
import math
from functools import partial

import jax
import jax.numpy as jnp
from jax.experimental import pallas as pl
from jax.experimental.pallas import tpu as pltpu


# ---------------------------------------------------------------------------
# Kernel: one grid step = (batch chunk, encoder layer).
# x (the activations for the whole chunk) lives in a VMEM scratch across the
# layer axis; per-layer weights are streamed by BlockSpec.
# ---------------------------------------------------------------------------

def fused_layer_kernel(emb_ref, pe_ref, mask_ref,
                       wqkv_ref, wo_ref, w1_ref, w2_ref,
                       pvd_ref, pvf_ref, dec_w_ref, dec_b_ref,
                       o_ref, x_ref,
                       *, H, S, bc, emb_scale, eps=1e-5):
    l = pl.program_id(1)
    L = pl.num_programs(1)
    D = x_ref.shape[-1]
    hd = D // H
    mxdt = wqkv_ref.dtype                       # bf16 matmul inputs, f32 accumulate

    # ---- first layer of this chunk: embed*sqrt(D) + positional encoding -------
    @pl.when(l == 0)
    def _():
        x_ref[...] = emb_ref[...] * emb_scale + pe_ref[...]

    x = x_ref[...]                              # (M, D) f32, M = bc*S

    pv = pvd_ref[0]                             # (6, D) f32 packed per-layer params
    bo, ln1w, ln1b = pv[0:1], pv[1:2], pv[2:3]
    b2, ln2w, ln2b = pv[3:4], pv[4:5], pv[5:6]
    b1 = pvf_ref[0]                             # (1, F) f32

    # ================= multi-head self-attention (post-norm) ===================
    # One fused QKV matmul (1/sqrt(hd) folded into Q columns, zero in_proj bias).
    qkv = jnp.dot(x.astype(mxdt), wqkv_ref[0],
                  preferred_element_type=jnp.float32)          # (M, 3D) f32

    def split_heads(t):                         # (M, D) -> (bc*H, S, hd)
        return jnp.stack([t[b * S:(b + 1) * S, h * hd:(h + 1) * hd]
                          for b in range(bc) for h in range(H)], axis=0)

    q = split_heads(qkv[:, 0:D]).astype(mxdt)
    k = split_heads(qkv[:, D:2 * D]).astype(mxdt)
    v = split_heads(qkv[:, 2 * D:3 * D]).astype(mxdt)

    # scores (scale already folded into Wq) + additive mask, softmax in f32
    s = jnp.einsum('hqd,hkd->hqk', q, k,
                   preferred_element_type=jnp.float32) + mask_ref[...][None]
    m = jnp.max(s, axis=-1, keepdims=True)
    p = jnp.exp(s - m)
    # approx reciprocal hits the EUP slot; ~1e-3 rel. error vs exact division.
    p = p * pl.reciprocal(jnp.sum(p, axis=-1, keepdims=True), approx=True)

    ctx = jnp.einsum('hqk,hkd->hqd', p.astype(mxdt), v,
                     preferred_element_type=jnp.float32)        # (bc*H, S, hd) f32

    # fold heads back to (M, D) and do ONE output-projection matmul (K = D)
    ctx2 = jnp.concatenate(
        [jnp.concatenate([ctx[b * H + h] for h in range(H)], axis=-1)
         for b in range(bc)], axis=0)                           # (M, D) f32
    attn = jnp.dot(ctx2.astype(mxdt), wo_ref[0],
                   preferred_element_type=jnp.float32) + bo

    def layer_norm(y, w, b):
        mu = jnp.mean(y, axis=-1, keepdims=True)
        var = jnp.mean((y - mu) ** 2, axis=-1, keepdims=True)
        return (y - mu) * jax.lax.rsqrt(var + eps) * w + b

    # ---- residual + LayerNorm 1 (f32) ----
    x = layer_norm(x + attn, ln1w, ln1b)

    # ---- feed-forward (ReLU) ----
    hid = jnp.maximum(
        jnp.dot(x.astype(mxdt), w1_ref[0],
                preferred_element_type=jnp.float32) + b1, 0.0)
    ff = jnp.dot(hid.astype(mxdt), w2_ref[0],
                 preferred_element_type=jnp.float32) + b2

    # ---- residual + LayerNorm 2 (f32) ----
    x = layer_norm(x + ff, ln2w, ln2b)
    x_ref[...] = x

    # ---- decoder: Linear(d_model -> classes), lane-dense padded output --------
    @pl.when(l == L - 1)
    def _():
        o_ref[...] = jnp.dot(x.astype(mxdt), dec_w_ref[...],
                             preferred_element_type=jnp.float32) + dec_b_ref[...]


# ---------------------------------------------------------------------------
# Parameters (deterministic synthetic init, stacked / packed per layer)
# ---------------------------------------------------------------------------

def init_params(key, ntoken, d_model, nhead, d_hid, nlayers, classes,
                max_len=5000, matmul_dtype=jnp.bfloat16, classes_pad=128):
    assert d_model % nhead == 0
    hd = d_model // nhead
    keys = jax.random.split(key, 2 + nlayers)
    params = {"nhead": nhead, "nlayers": nlayers, "classes": classes}

    # Embedding: uniform(-0.1, 0.1) like init_weights()
    params["embedding"] = jax.random.uniform(
        keys[0], (ntoken, d_model), jnp.float32, -0.1, 0.1)

    # Sinusoidal positional-encoding table (same formula as PositionalEncoding)
    pos = jnp.arange(max_len, dtype=jnp.float32)[:, None]
    div = jnp.exp(jnp.arange(0, d_model, 2, dtype=jnp.float32)
                  * (-math.log(10000.0) / d_model))
    params["pe"] = jnp.stack([jnp.sin(pos * div), jnp.cos(pos * div)],
                             axis=-1).reshape(max_len, d_model)

    def u(k, shape, s):
        return jax.random.uniform(k, shape, jnp.float32, -s, s)

    s_d = 1.0 / math.sqrt(d_model)
    s_h = 1.0 / math.sqrt(d_hid)
    wqkv, wo, w1, w2, pvd, pvf = [], [], [], [], [], []
    for li in range(nlayers):
        lk = jax.random.split(keys[2 + li], 8)
        wq = u(lk[0], (d_model, d_model), s_d) / math.sqrt(hd)   # fold attn scale
        wk = u(lk[1], (d_model, d_model), s_d)
        wv = u(lk[2], (d_model, d_model), s_d)
        wqkv.append(jnp.concatenate([wq, wk, wv], axis=1))       # (D, 3D)
        wo.append(u(lk[3], (d_model, d_model), s_d))             # (D, D)
        w1.append(u(lk[4], (d_model, d_hid), s_d))               # (D, F)
        b1 = u(lk[5], (d_hid,), s_d)
        w2.append(u(lk[6], (d_hid, d_model), s_h))               # (F, D)
        b2 = u(lk[7], (d_model,), s_h)
        # packed per-layer f32 params: [bo, ln1w, ln1b, b2, ln2w, ln2b]
        # (torch MHA out_proj bias / in_proj bias init to zero, LN weight=1 bias=0)
        pvd.append(jnp.stack([jnp.zeros(d_model), jnp.ones(d_model),
                              jnp.zeros(d_model), b2,
                              jnp.ones(d_model), jnp.zeros(d_model)], axis=0))
        pvf.append(b1[None, :])

    mdt = matmul_dtype
    params["wqkv"] = jnp.stack(wqkv).astype(mdt)                 # (L, D, 3D)
    params["wo"] = jnp.stack(wo).astype(mdt)                     # (L, D, D)
    params["w1"] = jnp.stack(w1).astype(mdt)                     # (L, D, F)
    params["w2"] = jnp.stack(w2).astype(mdt)                     # (L, F, D)
    params["pvd"] = jnp.stack(pvd)                               # (L, 6, D) f32
    params["pvf"] = jnp.stack(pvf)                               # (L, 1, F) f32

    # Decoder: weight uniform(-0.1, 0.1), bias zero; pad classes to lane-dense 128.
    cp = max(classes_pad, classes)
    dec_w = jax.random.uniform(keys[1], (d_model, classes), jnp.float32, -0.1, 0.1)
    params["dec_w"] = jnp.pad(dec_w, ((0, 0), (0, cp - classes))).astype(mdt)
    params["dec_b"] = jnp.zeros((1, cp), jnp.float32)
    return params


# ---------------------------------------------------------------------------
# Forward wrapper
# ---------------------------------------------------------------------------

def transformer_classifier_forward(src, src_mask, params, batch_chunk=None):
    """src: int32 [S, B], src_mask: float32 [S, S]. Returns [S, B, classes]."""
    S, B = src.shape
    D = params["embedding"].shape[1]
    H = params["nhead"]
    L = params["nlayers"]
    classes = params["classes"]
    Cp = params["dec_w"].shape[1]
    F = params["w1"].shape[-1]

    # batch folded into the matmul M dim; batch_chunk (e.g. B//2) re-introduces a
    # "parallel" grid axis so v7x's two TensorCores each take half the batch.
    bc = B if batch_chunk is None else batch_chunk
    assert B % bc == 0
    NB = B // bc
    M = bc * S

    # Embedding gather + [S,B] -> [B*S, D] reorder: cheap XLA glue around the kernel.
    emb = jnp.take(params["embedding"], src, axis=0)             # (S, B, D)
    emb = jnp.transpose(emb, (1, 0, 2)).reshape(B * S, D)        # (B*S, D)
    pe_rep = jnp.tile(params["pe"][:S], (bc, 1))                 # (bc*S, D)

    def full_spec(a):   # whole (small) array resident every grid step
        zeros = (0,) * a.ndim
        return pl.BlockSpec(a.shape, lambda b, l: zeros)

    per_layer = lambda shape: pl.BlockSpec((1,) + shape, lambda b, l: (l, 0, 0))

    out = pl.pallas_call(
        partial(fused_layer_kernel, H=H, S=S, bc=bc, emb_scale=math.sqrt(D)),
        grid=(NB, L),                                # layers stream, chunks parallel
        out_shape=jax.ShapeDtypeStruct((B * S, Cp), jnp.float32),
        in_specs=[
            pl.BlockSpec((M, D), lambda b, l: (b, 0)),           # emb chunk
            full_spec(pe_rep),
            full_spec(src_mask),
            per_layer((D, 3 * D)),                               # wqkv
            per_layer((D, D)),                                   # wo
            per_layer((D, F)),                                   # w1
            per_layer((F, D)),                                   # w2
            per_layer((6, D)),                                   # packed f32 (D-sized)
            per_layer((1, F)),                                   # packed f32 (F-sized)
            full_spec(params["dec_w"]),
            full_spec(params["dec_b"]),
        ],
        out_specs=pl.BlockSpec((M, Cp), lambda b, l: (b, 0)),
        scratch_shapes=[pltpu.VMEM((M, D), jnp.float32)],        # x carried over layers
        compiler_params=pltpu.CompilerParams(
            dimension_semantics=("parallel", "arbitrary"),
            vmem_limit_bytes=32 * 1024 * 1024),      # raise scoped VMEM (v5e default 16MiB)
    )(emb, pe_rep, src_mask, params["wqkv"], params["wo"],
      params["w1"], params["w2"], params["pvd"], params["pvf"],
      params["dec_w"], params["dec_b"])

    # back to PyTorch convention [seq, batch, classes] (drop lane padding)
    out = out.reshape(B, S, Cp)[:, :, :classes]
    return jnp.transpose(out, (1, 0, 2))


# ---------------------------------------------------------------------------

if __name__ == "__main__":
    ntoken, d_model, nhead, d_hid, nlayers, classes = 50, 32, 4, 64, 2, 4
    S, B = 8, 2

    key = jax.random.PRNGKey(0)
    pkey, skey = jax.random.split(key)
    params = init_params(pkey, ntoken, d_model, nhead, d_hid, nlayers, classes,
                         max_len=64)

    src = jax.random.randint(skey, (S, B), 0, ntoken, dtype=jnp.int32)
    # causal additive float mask (0 on/below diag, large negative above)
    src_mask = jnp.where(jnp.triu(jnp.ones((S, S), dtype=bool), k=1),
                         -1e9, 0.0).astype(jnp.float32)

    out = transformer_classifier_forward(src, src_mask, params)
    out = jax.block_until_ready(out)
    assert out.shape == (S, B, classes), out.shape
    assert bool(jnp.all(jnp.isfinite(out)))
    print("KERNEL_OK")
</pallas_src>

<mosaic_0001>
module attributes {stable_mosaic.version = 11 : i64} {
  func.func @fused_layer_kernel(%arg0: i32, %arg1: i32, %arg2: memref<16x32xf32, #tpu.memory_space<vmem>>, %arg3: memref<16x32xf32, #tpu.memory_space<vmem>>, %arg4: memref<8x8xf32, #tpu.memory_space<vmem>>, %arg5: memref<1x32x96xbf16, #tpu.memory_space<vmem>>, %arg6: memref<1x32x32xbf16, #tpu.memory_space<vmem>>, %arg7: memref<1x32x64xbf16, #tpu.memory_space<vmem>>, %arg8: memref<1x64x32xbf16, #tpu.memory_space<vmem>>, %arg9: memref<1x6x32xf32, #tpu.memory_space<vmem>>, %arg10: memref<1x1x64xf32, #tpu.memory_space<vmem>>, %arg11: memref<32x128xbf16, #tpu.memory_space<vmem>>, %arg12: memref<1x128xf32, #tpu.memory_space<vmem>>, %arg13: memref<16x128xf32, #tpu.memory_space<vmem>>, %arg14: memref<16x32xf32, #tpu.memory_space<vmem>>) attributes {dimension_semantics = [#tpu.dimension_semantics<parallel>, #tpu.dimension_semantics<arbitrary>], iteration_bounds = array<i64: 1, 2>, scalar_prefetch = 0 : i64, scratch_operands = 1 : i64, tpu.core_type = #tpu.core_type<tc>, window_params = [{transform_indices = @transform_0, window_bounds = array<i64: 16, 32>}, {pipeline_mode = #tpu.pipeline_mode<synchronous>, transform_indices = @transform_1, window_bounds = array<i64: 16, 32>}, {pipeline_mode = #tpu.pipeline_mode<synchronous>, transform_indices = @transform_2, window_bounds = array<i64: 8, 8>}, {transform_indices = @transform_3, window_bounds = array<i64: 1, 32, 96>}, {transform_indices = @transform_4, window_bounds = array<i64: 1, 32, 32>}, {transform_indices = @transform_5, window_bounds = array<i64: 1, 32, 64>}, {transform_indices = @transform_6, window_bounds = array<i64: 1, 64, 32>}, {transform_indices = @transform_7, window_bounds = array<i64: 1, 6, 32>}, {transform_indices = @transform_8, window_bounds = array<i64: 1, 1, 64>}, {pipeline_mode = #tpu.pipeline_mode<synchronous>, transform_indices = @transform_9, window_bounds = array<i64: 32, 128>}, {pipeline_mode = #tpu.pipeline_mode<synchronous>, transform_indices = @transform_10, window_bounds = array<i64: 1, 128>}, {transform_indices = @transform_11, window_bounds = array<i64: 16, 128>}]} {
    %c0_i32 = arith.constant 0 : i32
    %0 = arith.cmpi eq, %arg1, %c0_i32 : i32
    %1 = arith.extui %0 : i1 to i32
    %c0_i32_0 = arith.constant 0 : i32
    %2 = arith.cmpi ne, %1, %c0_i32_0 : i32
    scf.if %2 {
      %c0_43 = arith.constant 0 : index
      %c0_44 = arith.constant 0 : index
      %181 = vector.load %arg2[%c0_43, %c0_44] : memref<16x32xf32, #tpu.memory_space<vmem>>, vector<16x32xf32>
      %cst_45 = arith.constant 5.65685415 : f32
      %182 = vector.broadcast %cst_45 : f32 to vector<16x32xf32>
      %183 = arith.mulf %181, %182 : vector<16x32xf32>
      %c0_46 = arith.constant 0 : index
      %c0_47 = arith.constant 0 : index
      %184 = vector.load %arg3[%c0_46, %c0_47] : memref<16x32xf32, #tpu.memory_space<vmem>>, vector<16x32xf32>
      %185 = arith.addf %183, %184 : vector<16x32xf32>
      %c0_48 = arith.constant 0 : index
      %c0_49 = arith.constant 0 : index
      %186 = vector.load %arg14[%c0_48, %c0_49] : memref<16x32xf32, #tpu.memory_space<vmem>>, vector<16x32xf32>
      tpu.vector_store %arg14[%c0_48, %c0_49], %185 {strides = array<i32>} : memref<16x32xf32, #tpu.memory_space<vmem>>, vector<16x32xf32>,
    } else {
    }
    %c0 = arith.constant 0 : index
    %c0_1 = arith.constant 0 : index
    %3 = vector.load %arg14[%c0, %c0_1] : memref<16x32xf32, #tpu.memory_space<vmem>>, vector<16x32xf32>
    %c0_2 = arith.constant 0 : index
    %c0_3 = arith.constant 0 : index
    %c0_4 = arith.constant 0 : index
    %4 = vector.load %arg9[%c0_2, %c0_3, %c0_4] : memref<1x6x32xf32, #tpu.memory_space<vmem>>, vector<1x6x32xf32>
    %5 = vector.shape_cast %4 : vector<1x6x32xf32> to vector<6x32xf32>
    %6 = vector.extract_strided_slice %5 {offsets = [0, 0], sizes = [1, 32], strides = [1, 1]} : vector<6x32xf32> to vector<1x32xf32>
    %7 = vector.extract_strided_slice %5 {offsets = [1, 0], sizes = [1, 32], strides = [1, 1]} : vector<6x32xf32> to vector<1x32xf32>
    %8 = vector.extract_strided_slice %5 {offsets = [2, 0], sizes = [1, 32], strides = [1, 1]} : vector<6x32xf32> to vector<1x32xf32>
    %9 = vector.extract_strided_slice %5 {offsets = [3, 0], sizes = [1, 32], strides = [1, 1]} : vector<6x32xf32> to vector<1x32xf32>
    %10 = vector.extract_strided_slice %5 {offsets = [4, 0], sizes = [1, 32], strides = [1, 1]} : vector<6x32xf32> to vector<1x32xf32>
    %11 = vector.extract_strided_slice %5 {offsets = [5, 0], sizes = [1, 32], strides = [1, 1]} : vector<6x32xf32> to vector<1x32xf32>
    %c0_5 = arith.constant 0 : index
    %c0_6 = arith.constant 0 : index
    %c0_7 = arith.constant 0 : index
    %12 = vector.load %arg10[%c0_5, %c0_6, %c0_7] : memref<1x1x64xf32, #tpu.memory_space<vmem>>, vector<1x1x64xf32>
    %13 = vector.shape_cast %12 : vector<1x1x64xf32> to vector<1x64xf32>
    %14 = arith.truncf %3 : vector<16x32xf32> to vector<16x32xbf16>
    %c0_8 = arith.constant 0 : index
    %c0_9 = arith.constant 0 : index
    %c0_10 = arith.constant 0 : index
    %15 = vector.load %arg5[%c0_8, %c0_9, %c0_10] : memref<1x32x96xbf16, #tpu.memory_space<vmem>>, vector<1x32x96xbf16>
    %16 = vector.shape_cast %15 : vector<1x32x96xbf16> to vector<32x96xbf16>
    %cst = arith.constant dense<0.000000e+00> : vector<16x96xf32>
    %17 = tpu.matmul %14, %16, %cst {dimension_numbers = #tpu.dot_dimension_numbers<[1], [0], [0], [1], [0, 0, 1, 1], [], []>} : vector<16x32xbf16>, vector<32x96xbf16>, vector<16x96xf32> -> vector<16x96xf32>
    %18 = vector.extract_strided_slice %17 {offsets = [0, 0], sizes = [16, 32], strides = [1, 1]} : vector<16x96xf32> to vector<16x32xf32>
    %19 = vector.extract_strided_slice %18 {offsets = [0, 0], sizes = [8, 8], strides = [1, 1]} : vector<16x32xf32> to vector<8x8xf32>
    %20 = vector.extract_strided_slice %18 {offsets = [0, 8], sizes = [8, 8], strides = [1, 1]} : vector<16x32xf32> to vector<8x8xf32>
    %21 = vector.extract_strided_slice %18 {offsets = [0, 16], sizes = [8, 8], strides = [1, 1]} : vector<16x32xf32> to vector<8x8xf32>
    %22 = vector.extract_strided_slice %18 {offsets = [0, 24], sizes = [8, 8], strides = [1, 1]} : vector<16x32xf32> to vector<8x8xf32>
    %23 = vector.extract_strided_slice %18 {offsets = [8, 0], sizes = [8, 8], strides = [1, 1]} : vector<16x32xf32> to vector<8x8xf32>
    %24 = vector.extract_strided_slice %18 {offsets = [8, 8], sizes = [8, 8], strides = [1, 1]} : vector<16x32xf32> to vector<8x8xf32>
    %25 = vector.extract_strided_slice %18 {offsets = [8, 16], sizes = [8, 8], strides = [1, 1]} : vector<16x32xf32> to vector<8x8xf32>
    %26 = vector.extract_strided_slice %18 {offsets = [8, 24], sizes = [8, 8], strides = [1, 1]} : vector<16x32xf32> to vector<8x8xf32>
    %27 = vector.shape_cast %19 : vector<8x8xf32> to vector<1x8x8xf32>
    %28 = vector.shape_cast %20 : vector<8x8xf32> to vector<1x8x8xf32>
    %29 = vector.shape_cast %21 : vector<8x8xf32> to vector<1x8x8xf32>
    %30 = vector.shape_cast %22 : vector<8x8xf32> to vector<1x8x8xf32>
    %31 = vector.shape_cast %23 : vector<8x8xf32> to vector<1x8x8xf32>
    %32 = vector.shape_cast %24 : vector<8x8xf32> to vector<1x8x8xf32>
    %33 = vector.shape_cast %25 : vector<8x8xf32> to vector<1x8x8xf32>
    %34 = vector.shape_cast %26 : vector<8x8xf32> to vector<1x8x8xf32>
    %35 = tpu.concatenate %27, %28, %29, %30, %31, %32, %33, %34 in 0 : vector<1x8x8xf32>, vector<1x8x8xf32>, vector<1x8x8xf32>, vector<1x8x8xf32>, vector<1x8x8xf32>, vector<1x8x8xf32>, vector<1x8x8xf32>, vector<1x8x8xf32> -> vector<8x8x8xf32>
    %36 = arith.truncf %35 : vector<8x8x8xf32> to vector<8x8x8xbf16>
    %37 = vector.extract_strided_slice %17 {offsets = [0, 32], sizes = [16, 32], strides = [1, 1]} : vector<16x96xf32> to vector<16x32xf32>
    %38 = vector.extract_strided_slice %37 {offsets = [0, 0], sizes = [8, 8], strides = [1, 1]} : vector<16x32xf32> to vector<8x8xf32>
    %39 = vector.extract_strided_slice %37 {offsets = [0, 8], sizes = [8, 8], strides = [1, 1]} : vector<16x32xf32> to vector<8x8xf32>
    %40 = vector.extract_strided_slice %37 {offsets = [0, 16], sizes = [8, 8], strides = [1, 1]} : vector<16x32xf32> to vector<8x8xf32>
    %41 = vector.extract_strided_slice %37 {offsets = [0, 24], sizes = [8, 8], strides = [1, 1]} : vector<16x32xf32> to vector<8x8xf32>
    %42 = vector.extract_strided_slice %37 {offsets = [8, 0], sizes = [8, 8], strides = [1, 1]} : vector<16x32xf32> to vector<8x8xf32>
    %43 = vector.extract_strided_slice %37 {offsets = [8, 8], sizes = [8, 8], strides = [1, 1]} : vector<16x32xf32> to vector<8x8xf32>
    %44 = vector.extract_strided_slice %37 {offsets = [8, 16], sizes = [8, 8], strides = [1, 1]} : vector<16x32xf32> to vector<8x8xf32>
    %45 = vector.extract_strided_slice %37 {offsets = [8, 24], sizes = [8, 8], strides = [1, 1]} : vector<16x32xf32> to vector<8x8xf32>
    %46 = vector.shape_cast %38 : vector<8x8xf32> to vector<1x8x8xf32>
    %47 = vector.shape_cast %39 : vector<8x8xf32> to vector<1x8x8xf32>
    %48 = vector.shape_cast %40 : vector<8x8xf32> to vector<1x8x8xf32>
    %49 = vector.shape_cast %41 : vector<8x8xf32> to vector<1x8x8xf32>
    %50 = vector.shape_cast %42 : vector<8x8xf32> to vector<1x8x8xf32>
    %51 = vector.shape_cast %43 : vector<8x8xf32> to vector<1x8x8xf32>
    %52 = vector.shape_cast %44 : vector<8x8xf32> to vector<1x8x8xf32>
    %53 = vector.shape_cast %45 : vector<8x8xf32> to vector<1x8x8xf32>
    %54 = tpu.concatenate %46, %47, %48, %49, %50, %51, %52, %53 in 0 : vector<1x8x8xf32>, vector<1x8x8xf32>, vector<1x8x8xf32>, vector<1x8x8xf32>, vector<1x8x8xf32>, vector<1x8x8xf32>, vector<1x8x8xf32>, vector<1x8x8xf32> -> vector<8x8x8xf32>
    %55 = arith.truncf %54 : vector<8x8x8xf32> to vector<8x8x8xbf16>
    %56 = vector.extract_strided_slice %17 {offsets = [0, 64], sizes = [16, 32], strides = [1, 1]} : vector<16x96xf32> to vector<16x32xf32>
    %57 = vector.extract_strided_slice %56 {offsets = [0, 0], sizes = [8, 8], strides = [1, 1]} : vector<16x32xf32> to vector<8x8xf32>
    %58 = vector.extract_strided_slice %56 {offsets = [0, 8], sizes = [8, 8], strides = [1, 1]} : vector<16x32xf32> to vector<8x8xf32>
    %59 = vector.extract_strided_slice %56 {offsets = [0, 16], sizes = [8, 8], strides = [1, 1]} : vector<16x32xf32> to vector<8x8xf32>
    %60 = vector.extract_strided_slice %56 {offsets = [0, 24], sizes = [8, 8], strides = [1, 1]} : vector<16x32xf32> to vector<8x8xf32>
    %61 = vector.extract_strided_slice %56 {offsets = [8, 0], sizes = [8, 8], strides = [1, 1]} : vector<16x32xf32> to vector<8x8xf32>
    %62 = vector.extract_strided_slice %56 {offsets = [8, 8], sizes = [8, 8], strides = [1, 1]} : vector<16x32xf32> to vector<8x8xf32>
    %63 = vector.extract_strided_slice %56 {offsets = [8, 16], sizes = [8, 8], strides = [1, 1]} : vector<16x32xf32> to vector<8x8xf32>
    %64 = vector.extract_strided_slice %56 {offsets = [8, 24], sizes = [8, 8], strides = [1, 1]} : vector<16x32xf32> to vector<8x8xf32>
    %65 = vector.shape_cast %57 : vector<8x8xf32> to vector<1x8x8xf32>
    %66 = vector.shape_cast %58 : vector<8x8xf32> to vector<1x8x8xf32>
    %67 = vector.shape_cast %59 : vector<8x8xf32> to vector<1x8x8xf32>
    %68 = vector.shape_cast %60 : vector<8x8xf32> to vector<1x8x8xf32>
    %69 = vector.shape_cast %61 : vector<8x8xf32> to vector<1x8x8xf32>
    %70 = vector.shape_cast %62 : vector<8x8xf32> to vector<1x8x8xf32>
    %71 = vector.shape_cast %63 : vector<8x8xf32> to vector<1x8x8xf32>
    %72 = vector.shape_cast %64 : vector<8x8xf32> to vector<1x8x8xf32>
    %73 = tpu.concatenate %65, %66, %67, %68, %69, %70, %71, %72 in 0 : vector<1x8x8xf32>, vector<1x8x8xf32>, vector<1x8x8xf32>, vector<1x8x8xf32>, vector<1x8x8xf32>, vector<1x8x8xf32>, vector<1x8x8xf32>, vector<1x8x8xf32> -> vector<8x8x8xf32>
    %74 = arith.truncf %73 : vector<8x8x8xf32> to vector<8x8x8xbf16>
    "tpu.trace_start"() <{level = 10 : i32, message = "hqd,hkd->hqk"}> : () -> ()
    %cst_11 = arith.constant dense<0.000000e+00> : vector<8x8x8xf32>
    %75 = tpu.matmul %36, %55, %cst_11 {dimension_numbers = #tpu.dot_dimension_numbers<[2], [2], [1], [1], [0, 0, 0, 1, 1, 1], [0], [0]>} : vector<8x8x8xbf16>, vector<8x8x8xbf16>, vector<8x8x8xf32> -> vector<8x8x8xf32>
    "tpu.trace_stop"() : () -> ()
    %c0_12 = arith.constant 0 : index
    %c0_13 = arith.constant 0 : index
    %76 = vector.load %arg4[%c0_12, %c0_13] : memref<8x8xf32, #tpu.memory_space<vmem>>, vector<8x8xf32>
    %77 = vector.shape_cast %76 : vector<8x8xf32> to vector<1x8x8xf32>
    %78 = vector.broadcast %77 : vector<1x8x8xf32> to vector<8x8x8xf32>
    %79 = arith.addf %75, %78 : vector<8x8x8xf32>
    %cst_14 = arith.constant dense<0xFF800000> : vector<8x8xf32>
    %80 = vector.multi_reduction <maximumf>, %79, %cst_14 [2] : vector<8x8x8xf32> to vector<8x8xf32>
    %81 = vector.shape_cast %80 : vector<8x8xf32> to vector<8x8x1xf32>
    %82 = vector.broadcast %81 : vector<8x8x1xf32> to vector<8x8x8xf32>
    %83 = arith.subf %79, %82 : vector<8x8x8xf32>
    %84 = math.exp %83 : vector<8x8x8xf32>
    %cst_15 = arith.constant dense<0.000000e+00> : vector<8x8xf32>
    %85 = vector.multi_reduction <add>, %84, %cst_15 [2] : vector<8x8x8xf32> to vector<8x8xf32>
    %86 = vector.shape_cast %85 : vector<8x8xf32> to vector<8x8x1xf32>
    %87 = tpu.reciprocal %86 {approx = true} : vector<8x8x1xf32> -> vector<8x8x1xf32>
    %88 = vector.broadcast %87 : vector<8x8x1xf32> to vector<8x8x8xf32>
    %89 = arith.mulf %84, %88 : vector<8x8x8xf32>
    %90 = arith.truncf %89 : vector<8x8x8xf32> to vector<8x8x8xbf16>
    "tpu.trace_start"() <{level = 10 : i32, message = "hqk,hkd->hqd"}> : () -> ()
    %cst_16 = arith.constant dense<0.000000e+00> : vector<8x8x8xf32>
    %91 = tpu.matmul %90, %74, %cst_16 {dimension_numbers = #tpu.dot_dimension_numbers<[2], [1], [1], [2], [0, 0, 0, 1, 1, 2], [0], [0]>} : vector<8x8x8xbf16>, vector<8x8x8xbf16>, vector<8x8x8xf32> -> vector<8x8x8xf32>
    "tpu.trace_stop"() : () -> ()
    %92 = vector.extract_strided_slice %91 {offsets = [0, 0, 0], sizes = [1, 8, 8], strides = [1, 1, 1]} : vector<8x8x8xf32> to vector<1x8x8xf32>
    %93 = vector.shape_cast %92 : vector<1x8x8xf32> to vector<8x8xf32>
    %94 = vector.extract_strided_slice %91 {offsets = [1, 0, 0], sizes = [1, 8, 8], strides = [1, 1, 1]} : vector<8x8x8xf32> to vector<1x8x8xf32>
    %95 = vector.shape_cast %94 : vector<1x8x8xf32> to vector<8x8xf32>
    %96 = vector.extract_strided_slice %91 {offsets = [2, 0, 0], sizes = [1, 8, 8], strides = [1, 1, 1]} : vector<8x8x8xf32> to vector<1x8x8xf32>
    %97 = vector.shape_cast %96 : vector<1x8x8xf32> to vector<8x8xf32>
    %98 = vector.extract_strided_slice %91 {offsets = [3, 0, 0], sizes = [1, 8, 8], strides = [1, 1, 1]} : vector<8x8x8xf32> to vector<1x8x8xf32>
    %99 = vector.shape_cast %98 : vector<1x8x8xf32> to vector<8x8xf32>
    %100 = tpu.concatenate %93, %95, %97, %99 in 1 : vector<8x8xf32>, vector<8x8xf32>, vector<8x8xf32>, vector<8x8xf32> -> vector<8x32xf32>
    %101 = vector.extract_strided_slice %91 {offsets = [4, 0, 0], sizes = [1, 8, 8], strides = [1, 1, 1]} : vector<8x8x8xf32> to vector<1x8x8xf32>
    %102 = vector.shape_cast %101 : vector<1x8x8xf32> to vector<8x8xf32>
    %103 = vector.extract_strided_slice %91 {offsets = [5, 0, 0], sizes = [1, 8, 8], strides = [1, 1, 1]} : vector<8x8x8xf32> to vector<1x8x8xf32>
    %104 = vector.shape_cast %103 : vector<1x8x8xf32> to vector<8x8xf32>
    %105 = vector.extract_strided_slice %91 {offsets = [6, 0, 0], sizes = [1, 8, 8], strides = [1, 1, 1]} : vector<8x8x8xf32> to vector<1x8x8xf32>
    %106 = vector.shape_cast %105 : vector<1x8x8xf32> to vector<8x8xf32>
    %107 = vector.extract_strided_slice %91 {offsets = [7, 0, 0], sizes = [1, 8, 8], strides = [1, 1, 1]} : vector<8x8x8xf32> to vector<1x8x8xf32>
    %108 = vector.shape_cast %107 : vector<1x8x8xf32> to vector<8x8xf32>
    %109 = tpu.concatenate %102, %104, %106, %108 in 1 : vector<8x8xf32>, vector<8x8xf32>, vector<8x8xf32>, vector<8x8xf32> -> vector<8x32xf32>
    %110 = tpu.concatenate %100, %109 in 0 : vector<8x32xf32>, vector<8x32xf32> -> vector<16x32xf32>
    %111 = arith.truncf %110 : vector<16x32xf32> to vector<16x32xbf16>
    %c0_17 = arith.constant 0 : index
    %c0_18 = arith.constant 0 : index
    %c0_19 = arith.constant 0 : index
    %112 = vector.load %arg6[%c0_17, %c0_18, %c0_19] : memref<1x32x32xbf16, #tpu.memory_space<vmem>>, vector<1x32x32xbf16>
    %113 = vector.shape_cast %112 : vector<1x32x32xbf16> to vector<32x32xbf16>
    %cst_20 = arith.constant dense<0.000000e+00> : vector<16x32xf32>
    %114 = tpu.matmul %111, %113, %cst_20 {dimension_numbers = #tpu.dot_dimension_numbers<[1], [0], [0], [1], [0, 0, 1, 1], [], []>} : vector<16x32xbf16>, vector<32x32xbf16>, vector<16x32xf32> -> vector<16x32xf32>
    %115 = vector.broadcast %6 : vector<1x32xf32> to vector<16x32xf32>
    %116 = arith.addf %114, %115 : vector<16x32xf32>
    %117 = arith.addf %3, %116 : vector<16x32xf32>
    %cst_21 = arith.constant dense<0.000000e+00> : vector<16xf32>
    %118 = vector.multi_reduction <add>, %117, %cst_21 [1] : vector<16x32xf32> to vector<16xf32>
    %119 = vector.shape_cast %118 : vector<16xf32> to vector<16x1xf32>
    %cst_22 = arith.constant 3.200000e+01 : f32
    %120 = vector.broadcast %cst_22 : f32 to vector<16x1xf32>
    %121 = arith.divf %119, %120 : vector<16x1xf32>
    %122 = vector.broadcast %121 : vector<16x1xf32> to vector<16x32xf32>
    %123 = arith.subf %117, %122 : vector<16x32xf32>
    %124 = arith.mulf %123, %123 : vector<16x32xf32>
    %cst_23 = arith.constant dense<0.000000e+00> : vector<16xf32>
    %125 = vector.multi_reduction <add>, %124, %cst_23 [1] : vector<16x32xf32> to vector<16xf32>
    %126 = vector.shape_cast %125 : vector<16xf32> to vector<16x1xf32>
    %cst_24 = arith.constant 3.200000e+01 : f32
    %127 = vector.broadcast %cst_24 : f32 to vector<16x1xf32>
    %128 = arith.divf %126, %127 : vector<16x1xf32>
    %129 = vector.broadcast %121 : vector<16x1xf32> to vector<16x32xf32>
    %130 = arith.subf %117, %129 : vector<16x32xf32>
    %cst_25 = arith.constant 9.99999974E-6 : f32
    %131 = vector.broadcast %cst_25 : f32 to vector<16x1xf32>
    %132 = arith.addf %128, %131 : vector<16x1xf32>
    %133 = math.rsqrt %132 : vector<16x1xf32>
    %134 = vector.broadcast %133 : vector<16x1xf32> to vector<16x32xf32>
    %135 = arith.mulf %130, %134 : vector<16x32xf32>
    %136 = vector.broadcast %7 : vector<1x32xf32> to vector<16x32xf32>
    %137 = arith.mulf %135, %136 : vector<16x32xf32>
    %138 = vector.broadcast %8 : vector<1x32xf32> to vector<16x32xf32>
    %139 = arith.addf %137, %138 : vector<16x32xf32>
    %140 = arith.truncf %139 : vector<16x32xf32> to vector<16x32xbf16>
    %c0_26 = arith.constant 0 : index
    %c0_27 = arith.constant 0 : index
    %c0_28 = arith.constant 0 : index
    %141 = vector.load %arg7[%c0_26, %c0_27, %c0_28] : memref<1x32x64xbf16, #tpu.memory_space<vmem>>, vector<1x32x64xbf16>
    %142 = vector.shape_cast %141 : vector<1x32x64xbf16> to vector<32x64xbf16>
    %cst_29 = arith.constant dense<0.000000e+00> : vector<16x64xf32>
    %143 = tpu.matmul %140, %142, %cst_29 {dimension_numbers = #tpu.dot_dimension_numbers<[1], [0], [0], [1], [0, 0, 1, 1], [], []>} : vector<16x32xbf16>, vector<32x64xbf16>, vector<16x64xf32> -> vector<16x64xf32>
    %144 = vector.broadcast %13 : vector<1x64xf32> to vector<16x64xf32>
    %145 = arith.addf %143, %144 : vector<16x64xf32>
    %cst_30 = arith.constant 0.000000e+00 : f32
    %146 = vector.broadcast %cst_30 : f32 to vector<16x64xf32>
    %147 = arith.maximumf %145, %146 : vector<16x64xf32>
    %148 = arith.truncf %147 : vector<16x64xf32> to vector<16x64xbf16>
    %c0_31 = arith.constant 0 : index
    %c0_32 = arith.constant 0 : index
    %c0_33 = arith.constant 0 : index
    %149 = vector.load %arg8[%c0_31, %c0_32, %c0_33] : memref<1x64x32xbf16, #tpu.memory_space<vmem>>, vector<1x64x32xbf16>
    %150 = vector.shape_cast %149 : vector<1x64x32xbf16> to vector<64x32xbf16>
    %cst_34 = arith.constant dense<0.000000e+00> : vector<16x32xf32>
    %151 = tpu.matmul %148, %150, %cst_34 {dimension_numbers = #tpu.dot_dimension_numbers<[1], [0], [0], [1], [0, 0, 1, 1], [], []>} : vector<16x64xbf16>, vector<64x32xbf16>, vector<16x32xf32> -> vector<16x32xf32>
    %152 = vector.broadcast %9 : vector<1x32xf32> to vector<16x32xf32>
    %153 = arith.addf %151, %152 : vector<16x32xf32>
    %154 = arith.addf %139, %153 : vector<16x32xf32>
    %cst_35 = arith.constant dense<0.000000e+00> : vector<16xf32>
    %155 = vector.multi_reduction <add>, %154, %cst_35 [1] : vector<16x32xf32> to vector<16xf32>
    %156 = vector.shape_cast %155 : vector<16xf32> to vector<16x1xf32>
    %cst_36 = arith.constant 3.200000e+01 : f32
    %157 = vector.broadcast %cst_36 : f32 to vector<16x1xf32>
    %158 = arith.divf %156, %157 : vector<16x1xf32>
    %159 = vector.broadcast %158 : vector<16x1xf32> to vector<16x32xf32>
    %160 = arith.subf %154, %159 : vector<16x32xf32>
    %161 = arith.mulf %160, %160 : vector<16x32xf32>
    %cst_37 = arith.constant dense<0.000000e+00> : vector<16xf32>
    %162 = vector.multi_reduction <add>, %161, %cst_37 [1] : vector<16x32xf32> to vector<16xf32>
    %163 = vector.shape_cast %162 : vector<16xf32> to vector<16x1xf32>
    %cst_38 = arith.constant 3.200000e+01 : f32
    %164 = vector.broadcast %cst_38 : f32 to vector<16x1xf32>
    %165 = arith.divf %163, %164 : vector<16x1xf32>
    %166 = vector.broadcast %158 : vector<16x1xf32> to vector<16x32xf32>
    %167 = arith.subf %154, %166 : vector<16x32xf32>
    %cst_39 = arith.constant 9.99999974E-6 : f32
    %168 = vector.broadcast %cst_39 : f32 to vector<16x1xf32>
    %169 = arith.addf %165, %168 : vector<16x1xf32>
    %170 = math.rsqrt %169 : vector<16x1xf32>
    %171 = vector.broadcast %170 : vector<16x1xf32> to vector<16x32xf32>
    %172 = arith.mulf %167, %171 : vector<16x32xf32>
    %173 = vector.broadcast %10 : vector<1x32xf32> to vector<16x32xf32>
    %174 = arith.mulf %172, %173 : vector<16x32xf32>
    %175 = vector.broadcast %11 : vector<1x32xf32> to vector<16x32xf32>
    %176 = arith.addf %174, %175 : vector<16x32xf32>
    %c0_40 = arith.constant 0 : index
    %c0_41 = arith.constant 0 : index
    %177 = vector.load %arg14[%c0_40, %c0_41] : memref<16x32xf32, #tpu.memory_space<vmem>>, vector<16x32xf32>
    tpu.vector_store %arg14[%c0_40, %c0_41], %176 {strides = array<i32>} : memref<16x32xf32, #tpu.memory_space<vmem>>, vector<16x32xf32>,
    %c1_i32 = arith.constant 1 : i32
    %178 = arith.cmpi eq, %arg1, %c1_i32 : i32
    %179 = arith.extui %178 : i1 to i32
    %c0_i32_42 = arith.constant 0 : i32
    %180 = arith.cmpi ne, %179, %c0_i32_42 : i32
    scf.if %180 {
      %181 = arith.truncf %176 : vector<16x32xf32> to vector<16x32xbf16>
      %c0_43 = arith.constant 0 : index
      %c0_44 = arith.constant 0 : index
      %182 = vector.load %arg11[%c0_43, %c0_44] : memref<32x128xbf16, #tpu.memory_space<vmem>>, vector<32x128xbf16>
      %cst_45 = arith.constant dense<0.000000e+00> : vector<16x128xf32>
      %183 = tpu.matmul %181, %182, %cst_45 {dimension_numbers = #tpu.dot_dimension_numbers<[1], [0], [0], [1], [0, 0, 1, 1], [], []>} : vector<16x32xbf16>, vector<32x128xbf16>, vector<16x128xf32> -> vector<16x128xf32>
      %c0_46 = arith.constant 0 : index
      %c0_47 = arith.constant 0 : index
      %184 = vector.load %arg12[%c0_46, %c0_47] : memref<1x128xf32, #tpu.memory_space<vmem>>, vector<1x128xf32>
      %185 = vector.broadcast %184 : vector<1x128xf32> to vector<16x128xf32>
      %186 = arith.addf %183, %185 : vector<16x128xf32>
      %c0_48 = arith.constant 0 : index
      %c0_49 = arith.constant 0 : index
      %187 = vector.load %arg13[%c0_48, %c0_49] : memref<16x128xf32, #tpu.memory_space<vmem>>, vector<16x128xf32>
      tpu.vector_store %arg13[%c0_48, %c0_49], %186 {strides = array<i32>} : memref<16x128xf32, #tpu.memory_space<vmem>>, vector<16x128xf32>,
    } else {
    }
    return
  }
  func.func @transform_0(%arg0: i32, %arg1: i32) -> (i32, i32) {
    %c0_i32 = arith.constant 0 : i32
    %c0_i32_0 = arith.constant 0 : i32
    return %arg0, %c0_i32 : i32, i32
  }
  func.func @transform_1(%arg0: i32, %arg1: i32) -> (i32, i32) {
    %c0_i32 = arith.constant 0 : i32
    %c0_i32_0 = arith.constant 0 : i32
    %c0_i32_1 = arith.constant 0 : i32
    return %c0_i32, %c0_i32_0 : i32, i32
  }
  func.func @transform_2(%arg0: i32, %arg1: i32) -> (i32, i32) {
    %c0_i32 = arith.constant 0 : i32
    %c0_i32_0 = arith.constant 0 : i32
    %c0_i32_1 = arith.constant 0 : i32
    return %c0_i32, %c0_i32_0 : i32, i32
  }
  func.func @transform_3(%arg0: i32, %arg1: i32) -> (i32, i32, i32) {
    %c0_i32 = arith.constant 0 : i32
    %c0_i32_0 = arith.constant 0 : i32
    %c0_i32_1 = arith.constant 0 : i32
    return %arg1, %c0_i32, %c0_i32_0 : i32, i32, i32
  }
  func.func @transform_4(%arg0: i32, %arg1: i32) -> (i32, i32, i32) {
    %c0_i32 = arith.constant 0 : i32
    %c0_i32_0 = arith.constant 0 : i32
    %c0_i32_1 = arith.constant 0 : i32
    return %arg1, %c0_i32, %c0_i32_0 : i32, i32, i32
  }
  func.func @transform_5(%arg0: i32, %arg1: i32) -> (i32, i32, i32) {
    %c0_i32 = arith.constant 0 : i32
    %c0_i32_0 = arith.constant 0 : i32
    %c0_i32_1 = arith.constant 0 : i32
    return %arg1, %c0_i32, %c0_i32_0 : i32, i32, i32
  }
  func.func @transform_6(%arg0: i32, %arg1: i32) -> (i32, i32, i32) {
    %c0_i32 = arith.constant 0 : i32
    %c0_i32_0 = arith.constant 0 : i32
    %c0_i32_1 = arith.constant 0 : i32
    return %arg1, %c0_i32, %c0_i32_0 : i32, i32, i32
  }
  func.func @transform_7(%arg0: i32, %arg1: i32) -> (i32, i32, i32) {
    %c0_i32 = arith.constant 0 : i32
    %c0_i32_0 = arith.constant 0 : i32
    %c0_i32_1 = arith.constant 0 : i32
    return %arg1, %c0_i32, %c0_i32_0 : i32, i32, i32
  }
  func.func @transform_8(%arg0: i32, %arg1: i32) -> (i32, i32, i32) {
    %c0_i32 = arith.constant 0 : i32
    %c0_i32_0 = arith.constant 0 : i32
    %c0_i32_1 = arith.constant 0 : i32
    return %arg1, %c0_i32, %c0_i32_0 : i32, i32, i32
  }
  func.func @transform_9(%arg0: i32, %arg1: i32) -> (i32, i32) {
    %c0_i32 = arith.constant 0 : i32
    %c0_i32_0 = arith.constant 0 : i32
    %c0_i32_1 = arith.constant 0 : i32
    return %c0_i32, %c0_i32_0 : i32, i32
  }
  func.func @transform_10(%arg0: i32, %arg1: i32) -> (i32, i32) {
    %c0_i32 = arith.constant 0 : i32
    %c0_i32_0 = arith.constant 0 : i32
    %c0_i32_1 = arith.constant 0 : i32
    return %c0_i32, %c0_i32_0 : i32, i32
  }
  func.func @transform_11(%arg0: i32, %arg1: i32) -> (i32, i32) {
    %c0_i32 = arith.constant 0 : i32
    %c0_i32_0 = arith.constant 0 : i32
    return %arg0, %c0_i32 : i32, i32
  }
}

</mosaic_0001>

<bundles_post_ra>
// kernel: tpu_custom_call.1
= control target key start
LH: loop header
LB: loop body
LE: loop exit
PB: predicated region body
PF: predicated region fallthrough
CT: control target
= control target key end

     0   :  { %s3185_s0 = inlined_call_operand.vmem [shape: f32[16,32], index: 0, kind: input, shape index: {}]   ;;  %s3186_s1 = inlined_call_operand.hbm [shape: f32[16,32], index: 1, kind: input, shape index: {}]   ;;  %s3187_s2 = inlined_call_operand.hbm [shape: f32[8,8], index: 2, kind: input, shape index: {}]   ;;  %s3188_s3 = inlined_call_operand.vmem [shape: bf16[2,32,96], index: 3, kind: input, shape index: {}]   ;;  %s3189_s4 = inlined_call_operand.vmem [shape: bf16[2,32,32], index: 4, kind: input, shape index: {}]   ;;  %s3190_s5 = inlined_call_operand.vmem [shape: bf16[2,32,64], index: 5, kind: input, shape index: {}]   ;;  %s3191_s6 = inlined_call_operand.vmem [shape: bf16[2,64,32], index: 6, kind: input, shape index: {}]   ;;  %s3192_s7 = inlined_call_operand.vmem [shape: f32[2,6,32], index: 7, kind: input, shape index: {}]   ;;  %s3193_s8 = inlined_call_operand.vmem [shape: f32[2,1,64], index: 8, kind: input, shape index: {}]   ;;  %s3194_s9 = inlined_call_operand.hbm [shape: bf16[32,128], index: 9, kind: input, shape index: {}]   ;;  %s3195_s10 = inlined_call_operand.vmem [shape: f32[1,128], index: 10, kind: input, shape index: {}]   ;;  %s3196_s11 = inlined_call_operand.hbm [shape: f32[16,128], index: 11, kind: output, shape index: {}]  }
   0x1   :  { %3202 = sst [smem:[#allocation15_spill]] %s3186_s1 }
   0x2   :  { %3203 = sst [smem:[#allocation16_spill]] %s3187_s2 }
   0x3   :  { %16 = vsyncpa [#allocation4], 0 }
   0x4   :  { %17 = vsyncpa [#allocation7], 0 }
   0x5   :  { %18 = vsyncpa [#allocation5], 0  ;;  %s2728_s17 = smov 0   ;;  %s2730_s18 = smov 0  }
   0x6   :  { %s2732_s19 = smov 0  }
   0x7 LB: > { %3204 = sst [smem:[#allocation13_spill]] %s2641_s18  ;;  %s2647_s20 = smov [#allocation6]   ;;  %s2645_s19 = sphi %s2732_s19, %s24_s19   ;;  %s2641_s18 = sphi %s2730_s18, %s3219_s18   ;;  %s2637_s17 = sphi %s2728_s17, %s3218_s17  }
   0x8   : > { %s368_s21 = sshll.u32 %s2647_s20, 4  ;;  %s3200_s22 = sadd.s32 4294967295, %s2645_s19   ;;  %s369_s21 = int_to_ptr.vmem [resolvable:$true] %s368_s21 }
   0x9   : > { %p2102_p0 = scmp.ge.s32.totalorder %s2645_s19, 1  ;;  %p333_p1 = scmp.lt.s32.totalorder %s2645_s19, 3 }
   0xa   : > { %p2748_p2 = scmp.eq.s32.totalorder %s3200_s22, 0  ;;  %s33_s25 = sadd.s32 1, %s2641_s18 }
   0xb   : > { %p2752_p3 = pnand %p2102_p0, %p333_p1  ;;  %p2765_p6 = scmp.ge.s32.totalorder %s33_s25, 2 }
   0xc   : > { %s3205_s23 = scalar_select %p2748_p2, 1, 0 }
   0xd   : > { %s3206_s24 = scalar_select %p2752_p3, 1, 0 }
   0xe   : > { %p2371_p4 = pneg %p2752_p3  ;;  %s2648_s28 = smov [#allocation3]  }
   0xf   : > { %s3208_s27 = scalar_select %p2765_p6, 1, 0 }
  0x10   : > { %p2761_p5 = pnand %p2748_p2, %p2371_p4  ;;  %s354_s29 = sshll.u32 %s2648_s28, 4  ;;  %s2769_s29 = int_to_ptr.vmem [resolvable:$true] %s354_s29 }
  0x11   : > { %s3209_s2 = sld [smem:[#allocation16_spill]] }
  0x12   : > { %p2779_p8 = pneg %p2761_p5 }
  0x17   : > { %s2501_s13 = scalar_lea.hbm %s3209_s2, 128 }
  0x18   : > { %p2502_p7 = scmp.ne.s32.totalorder %s3209_s2, %s2501_s13  ;;  %p2508_p11 = scmp.lt.u32.totalorder %s2501_s13, %s3209_s2 }
  0x1a   : > { %p2504_p9 = pnand %p2779_p8, %p2502_p7 }
  0x1c   : > { %p2505_p10 = pneg %p2504_p9 }
  0x1e   : > { %p2510_p12 = pnand %p2508_p11, %p2505_p10 }
  0x20   : > { %2513 = shalt.err (!%p2510_p12)
}
  0x21   : > { %s2514_s30 = scalar_lea.vmem %s369_s21, 128  ;;  %p2522_p4 = scmp.lt.s32.totalorder %s369_s21, %s369_s21 }
  0x22   : > { %p2515_p13 = scmp.ne.s32.totalorder %s369_s21, %s2514_s30  ;;  %p2523_p2 = scmp.lt.s32.totalorder %s2514_s30, %s2514_s30 }
  0x24   : > { %p2517_p0 = pnand %p2515_p13, %p2779_p8  ;;  %p2524_p3 = por %p2523_p2, %p2522_p4 }
  0x26   : > { %p2518_p1 = pneg %p2517_p0 }
  0x28   : > { %p2525_p6 = pnand %p2524_p3, %p2518_p1 }
  0x2a   : > { %2528 = shalt.err (!%p2525_p6)
}
  0x2b   : > { %2377 = dma.hbm_to_vmem [thread:$0]  (!%p2761_p5), %s3209_s2, 128, %s369_s21, [#allocation7]  }
  0x2c   : > { %p3211_p7 = scmp.ne.s32.totalorder %s3208_s27, 0  ;;  %s3213_s1 = sld [smem:[#allocation15_spill]] }
  0x2e   : > { %s3221_s25 = smov (%p3211_p7, %s33_s25), 0 }
  0x2f   : > { %3212 = sst [smem:[#allocation14_spill]] %s3221_s25 }
  0x32   : > { %s2529_s20 = scalar_lea.hbm %s3213_s1, 256 }
  0x33   : > { %p2530_p2 = scmp.ne.s32.totalorder %s3213_s1, %s2529_s20  ;;  %p2536_p9 = scmp.lt.u32.totalorder %s2529_s20, %s3213_s1 }
  0x35   : > { %p2532_p3 = pnand %p2530_p2, %p2779_p8 }
  0x37   : > { %p2533_p6 = pneg %p2532_p3 }
  0x39   : > { %p2538_p10 = pnand %p2536_p9, %p2533_p6 }
  0x3b   : > { %2541 = shalt.err (!%p2538_p10)
}
  0x3c   : > { %s2542_s21 = scalar_lea.vmem %s2769_s29, 256  ;;  %p2550_p0 = scmp.lt.s32.totalorder %s2769_s29, %s2769_s29 }
  0x3d   : > { %p2543_p11 = scmp.ne.s32.totalorder %s2769_s29, %s2542_s21  ;;  %p2551_p1 = scmp.lt.s32.totalorder %s2542_s21, %s2542_s21 }
  0x3f   : > { %p2545_p12 = pnand %p2543_p11, %p2779_p8  ;;  %p2552_p4 = por %p2551_p1, %p2550_p0 }
  0x41   : > { %p2546_p13 = pneg %p2545_p12 }
  0x43   : > { %p2553_p7 = pnand %p2552_p4, %p2546_p13 }
  0x45   : > { %2556 = shalt.err (!%p2553_p7)
}
  0x46   : > { %s2649_s27 = smov 128   ;;  %s2650_s18 = smov 8  }
  0x47   : > { %2374 = dma.hbm_to_vmem [thread:$0]  (!%p2761_p5), %s3213_s1, 256, %s2769_s29, [#allocation4], %s2649_s27, %s2649_s27, %s2650_s18  }
  0x48   : > { %s2651_s14 = smov [#allocation8]   ;;  %s2557_s28 = scalar_lea.hbm %s3194_s9, 256 }
  0x49   : > { %s378_s13 = sshll.u32 %s2651_s14, 4  ;;  %p2558_p2 = scmp.ne.s32.totalorder %s3194_s9, %s2557_s28  ;;  %s379_s13 = int_to_ptr.vmem [resolvable:$true] %s378_s13 }
  0x4a   : > { %p2564_p9 = scmp.lt.u32.totalorder %s2557_s28, %s3194_s9 }
  0x4b   : > { %p2560_p3 = pnand %p2558_p2, %p2779_p8 }
  0x4d   : > { %p2561_p6 = pneg %p2560_p3 }
  0x4f   : > { %p2566_p10 = pnand %p2564_p9, %p2561_p6 }
  0x51   : > { %2569 = shalt.err (!%p2566_p10)
}
  0x52   : > { %s2570_s29 = scalar_lea.vmem %s379_s13, 256  ;;  %p2578_p0 = scmp.lt.s32.totalorder %s379_s13, %s379_s13 }
  0x53   : > { %p2571_p11 = scmp.ne.s32.totalorder %s379_s13, %s2570_s29  ;;  %p2579_p1 = scmp.lt.s32.totalorder %s2570_s29, %s2570_s29 }
  0x55   : > { %p2573_p12 = pnand %p2571_p11, %p2779_p8  ;;  %p2580_p4 = por %p2579_p1, %p2578_p0 }
  0x57   : > { %p2574_p13 = pneg %p2573_p12 }
  0x59   : > { %p2581_p7 = pnand %p2580_p4, %p2574_p13 }
  0x5b   : > { %2584 = shalt.err (!%p2581_p7)
}
  0x5c   : > { %s2652_s27 = smov 64   ;;  %s2653_s18 = smov 4  }
  0x5d   : > { %2380 = dma.hbm_to_vmem [thread:$0]  (!%p2761_p5), %s3194_s9, 256, %s379_s13, [#allocation7], %s2652_s27, %s2652_s27, %s2653_s18  }
  0x5e   : > { %p3214_p2 = scmp.ne.s32.totalorder %s3206_s24, 0 }
  0x5f   : > { %p3215_p3 = scmp.ne.s32.totalorder (!%p3214_p2), %s3205_s23, 0 }
  0x60   : > { %442 = sbr.rel (%p3214_p2) target bundleno = 3040 (0xbe0), region = 64 }
  0x67   : > { %2624 = dma.done.wait (%p3215_p3), [#allocation4], 256  }
  0x68   : > { %2626 = vsyncadd (%p3215_p3), [#allocation4], 4294967040 }
  0x69   : > { %2628 = dma.done.wait (%p3215_p3), [#allocation7], 384  }
  0x6a   : > { %2630 = vsyncadd (%p3215_p3), [#allocation7], 4294966912  ;;  %p518_p8 = scmp.lt.s32.totalorder %s2637_s17, 1  ;;  %p2121_p5 = scmp.ne.s32.totalorder %s2637_s17, 0 }
  0x6b   : > { %v551_v0 = vld [vmem:[%s3185_s0] sm:$0xff] (!%p2121_p5)  ;;  %v555_v1 = vld [vmem:[#allocation3] sm:$0xff] (!%p2121_p5)  ;;  %v552_v2 = vld [vmem:[%s3185_s0 + $0x8] sm:$0xff] (!%p2121_p5)  ;;  %vm559_vm0 = vcmask (!%p2121_p5), 261120  }
  0x6c   : > { %s2852_s25 = scalar_select %p518_p8, %s2637_s17, 1 }
  0x6d   : > { %550 = sbr.rel (%p2121_p5) target bundleno = 116 (0x74), region = 80  ;;  %v553_v3 = vmul.f32 (!%p2121_p5), 5.656854, %v551_v0  ;;  %v554_v4 = vmul.f32 (!%p2121_p5), 5.656854, %v552_v2  ;;  %v556_v5 = vld [vmem:[#allocation3 + $0x8] sm:$0xff] (!%p2121_p5) }
  0x6e   : > { %s2162_s24 = sshll.u32 %s2852_s25, 4  ;;  %s2165_s26 = sshll.u32 %s2852_s25, 5 }
  0x6f   : > { %s522_s14 = scalar_lea.vmem %s3188_s3, %s2162_s24  ;;  %s2862_s23 = scalar_lea.vmem %s3189_s4, %s2162_s24  ;;  %v557_v6 = vadd.f32 (!%p2121_p5), %v555_v1, %v553_v3  ;;  %v558_v7 = vadd.f32 (!%p2121_p5), %v556_v5, %v554_v4 }
  0x70   : > { %s2867_s30 = scalar_lea.vmem %s3190_s5, %s2162_s24  ;;  %s2872_s27 = scalar_lea.vmem %s3191_s6, %s2165_s26 }
  0x71   : > { %s2120_s18 = sshll.u32 %s2852_s25, 3  ;;  %s544_s16 = scalar_lea.vmem %s3193_s8, %s2852_s25  ;;  %560 = vst.msk [vmem:[#allocation2] sm:$0xff] (!%p2121_p5), %vm559_vm0, %v557_v6  ;;  %561 = vst.msk [vmem:[#allocation2 + $0x8] sm:$0xff] (!%p2121_p5), %vm559_vm0, %v558_v7 }
  0x72   : > { %s2882_s13 = scalar_lea.vmem %s3192_s7, %s2120_s18 }
  0x74 PF: > { %v2449_v8 = vld [vmem:[%s522_s14] sm:$0xff]   ;;  %v2654_v9 = vmov 0.0   ;;  %v2450_v10 = vld [vmem:[%s522_s14 + $0x8] sm:$0xff]   ;;  %vm2655_vm1 = vmmov 0   ;;  %vm583_vm2 = vcmask 261120   ;;  %s2656_s1 = smov 104  }
  0x75   : > { %2215 = vmatprep.subr.bf16.mxu0 %v2654_v9  ;;  %2223 = vmatprep.subr.bf16.mxu1 %v2654_v9  ;;  %s2657_s14 = smov 120   ;;  %s2658_s28 = smov 112   ;;  %vm660_vm3 = vcmask 64512   ;;  %vm1151_vm4 = vcmask 1043456   ;;  %v656_v50 = vld [vmem:[#allocation6] sm:$0xff]  ;;  %vm1544_vm5 = vcmask 130048  }
  0x76   : > { %2216 = vmatpush3.bf16.msra.mxu0 %v2449_v8  ;;  %2219 = vmatprep.mubr.msk.bf16.mxu0 %vm2655_vm1, %v2654_v9  ;;  %s2659_s21 = smov 96   ;;  %s2660_s29 = smov 64   ;;  %vm1546_vm6 = vcmask 195584   ;;  %vm1775_vm7 = vcmask 523264  }
  0x77   : > { %2217 = vmatprep.subr.bf16.mxu0 %v2654_v9  ;;  %2225 = vmatprep.mubr.msk.bf16.mxu1 %vm2655_vm1, %v2654_v9  ;;  %s2661_s18 = smov 8   ;;  %s2662_s22 = smov 16  }
  0x78   : > { %v2895_v11 = vld [vmem:[#allocation2] sm:$0xff]  ;;  %v2897_v12 = vld [vmem:[#allocation2 + $0x8] sm:$0xff]  ;;  %p2153_p6 = scmp.ne.s32.totalorder %s2637_s17, 1 }
  0x79   : > { %v566_v13 = vpack.c.bf16 %v2897_v12, %v2895_v11  ;;  %vm2665_vm8 = vmmov (!%p2153_p6), 0  }
  0x7a   : > { %2218 = vmatpush3.bf16.msra.mxu0 %v2450_v10 }
  0x7b   : > { %2229 = vmatprep.subr.bf16.mxu0 %v2654_v9 }
  0x7d   : > { %2220 = vmatmul.mubr.msk.bf16.vlgmr.msra.gmra.mrb[0].mxu0 %vm583_vm2, %v566_v13 }
  0x7e   : > { %2231 = vmatprep.mubr.msk.bf16.mxu0 %vm2655_vm1, %v2654_v9 }
 0x150   : > { %v621_v14 = vpop.f32.mrb[0].mxu0 }
 0x151   : > { %635 = vrot.lane.b32.xlu1 %v621_v14, %s2656_s1  ;;  %629 = vrot.lane.b32.xlu0 %v621_v14, %s2657_s14  ;;  %v2221_v15 = vpop.f32.mrb[1].mxu0  ;;  %v648_v18 = vpack.c.bf16 %v621_v14, %v621_v14 }
 0x152   : > { %v624_v16 = vpop.f32.mrb[2].mxu0 }
 0x153   : > { %v2222_v17 = vpop.f32.mrb[3].mxu0  ;;  %v2919_v28 = vpack.c.bf16 %v624_v16, %v624_v16 }
 0x155   : > { %632 = vrot.lane.b32.xlu0 %v621_v14, %s2658_s28  ;;  %639 = vrot.lane.b32.xlu1 %v624_v16, %s2657_s14 }
 0x159   : > { %642 = vrot.lane.b32.xlu0 %v624_v16, %s2658_s28  ;;  %645 = vrot.lane.b32.xlu1 %v624_v16, %s2656_s1 }
 0x15d   : > { %658 = vrot.lane.b32.xlu0 %v648_v18, %s2659_s21 }
 0x1c3   : > { %v636_v19 = vpop.permute.xlu1 %635  ;;  %v630_v20 = vpop.permute.xlu0 %629 }
 0x1c4   : > { %v2908_v21 = vpack.c.bf16 %v630_v20, %v630_v20  ;;  %v2911_v24 = vpack.c.bf16 %v636_v19, %v636_v19 }
 0x1c6   : > { %708 = vrot.lane.b32.xlu1 %v2908_v21, %s2659_s21 }
 0x1c7   : > { %v633_v22 = vpop.permute.xlu0 %632  ;;  %v640_v23 = vpop.permute.xlu1 %639 }
 0x1c8   : > { %v2913_v25 = vpack.c.bf16 %v633_v22, %v633_v22  ;;  %v2917_v27 = vpack.c.bf16 %v640_v23, %v640_v23 }
 0x1ca   : > { %757 = vrot.lane.b32.xlu0 %v2913_v25, %s2659_s21  ;;  %806 = vrot.lane.b32.xlu1 %v2911_v24, %s2659_s21 }
 0x1cb   : > { %v643_v26 = vpop.permute.xlu0 %642  ;;  %v646_v29 = vpop.permute.xlu1 %645 }
 0x1cc   : > { %v2923_v31 = vpack.c.bf16 %v643_v26, %v643_v26  ;;  %v2925_v32 = vpack.c.bf16 %v646_v29, %v646_v29 }
 0x1ce   : > { %904 = vrot.lane.b32.xlu1 %v2917_v27, %s2659_s21  ;;  %855 = vrot.lane.b32.xlu0 %v2919_v28, %s2659_s21 }
 0x1cf   : > { %v659_v30 = vpop.permute.xlu0 %658 }
 0x1d0   : > { %v665_v33 = vsel %vm660_vm3, %v659_v30, 0 }
 0x1d1   : > { %2224 = vmatpush3.bf16.xpose.msra.mxu1 %v665_v33 }
 0x1d2   : > { %1002 = vrot.lane.b32.xlu1 %v2925_v32, %s2659_s21  ;;  %953 = vrot.lane.b32.xlu0 %v2923_v31, %s2659_s21 }
 0x1d3   : > { %2235 = vmatprep.subr.bf16.mxu1 %v2654_v9 }
 0x1d6   : > { %1146 = vrot.lane.b32.xlu1 %v648_v18, %s2660_s29 }
 0x1d8   : > { %2226 = vmatmul.mubr.msk.bf16.vlgmr.msra.gmra.mrb[0].mxu1 %vm660_vm3, %v648_v18 }
 0x1d9   : > { %2237 = vmatprep.mubr.msk.bf16.mxu1 %vm2655_vm1, %v2654_v9 }
 0x238   : > { %v709_v34 = vpop.permute.xlu1 %708 }
 0x239   : > { %v714_v35 = vsel %vm660_vm3, %v709_v34, 0 }
 0x23a   : > { %2230 = vmatpush3.bf16.xpose.msra.mxu0 %v714_v35 }
 0x23b   : > { %2241 = vmatprep.subr.bf16.mxu0 %v2654_v9 }
 0x23c   : > { %v758_v36 = vpop.permute.xlu0 %757  ;;  %v807_v38 = vpop.permute.xlu1 %806 }
 0x23d   : > { %v763_v37 = vsel %vm660_vm3, %v758_v36, 0  ;;  %v812_v39 = vsel %vm660_vm3, %v807_v38, 0 }
 0x23e   : > { %2236 = vmatpush3.bf16.xpose.msra.mxu1 %v763_v37 }
 0x23f   : > { %2247 = vmatprep.subr.bf16.mxu1 %v2654_v9 }
 0x240   : > { %v856_v40 = vpop.permute.xlu0 %855  ;;  %v905_v42 = vpop.permute.xlu1 %904 }
 0x241   : > { %2232 = vmatmul.mubr.msk.bf16.vlgmr.msra.gmra.mrb[4].mxu0 %vm660_vm3, %v2908_v21  ;;  %v861_v41 = vsel %vm660_vm3, %v856_v40, 0  ;;  %v910_v43 = vsel %vm660_vm3, %v905_v42, 0 }
 0x242   : > { %2242 = vmatpush3.bf16.xpose.msra.mxu0 %v812_v39  ;;  %2243 = vmatprep.mubr.msk.bf16.mxu0 %vm2655_vm1, %v2654_v9 }
 0x243   : > { %2253 = vmatprep.subr.bf16.mxu0 %v2654_v9 }
 0x244   : > { %v954_v44 = vpop.permute.xlu0 %953  ;;  %v1003_v45 = vpop.permute.xlu1 %1002 }
 0x245   : > { %2238 = vmatmul.mubr.msk.bf16.vlgmr.msra.gmra.mrb[4].mxu1 %vm660_vm3, %v2913_v25  ;;  %v959_v46 = vsel %vm660_vm3, %v954_v44, 0  ;;  %v1008_v47 = vsel %vm660_vm3, %v1003_v45, 0 }
 0x246   : > { %2248 = vmatpush3.bf16.xpose.msra.mxu1 %v861_v41  ;;  %2249 = vmatprep.mubr.msk.bf16.mxu1 %vm2655_vm1, %v2654_v9 }
 0x247   : > { %2259 = vmatprep.subr.bf16.mxu1 %v2654_v9 }
 0x248   : > { %v1147_v48 = vpop.permute.xlu1 %1146 }
 0x249   : > { %2244 = vmatmul.mubr.msk.bf16.vlgmr.msra.gmra.mrb[8].mxu0 %vm660_vm3, %v2911_v24  ;;  %v1153_v49 = vsel %vm1151_vm4, %v1147_v48, 0 }
 0x24a   : > { %2254 = vmatpush3.bf16.xpose.msra.mxu0 %v910_v43  ;;  %2255 = vmatprep.mubr.msk.bf16.mxu0 %vm2655_vm1, %v2654_v9 }
 0x24b   : > { %2265 = vmatprep.subr.bf16.mxu0 %v2654_v9 }
 0x24d   : > { %2250 = vmatmul.mubr.msk.bf16.vlgmr.msra.gmra.mrb[8].mxu1 %vm660_vm3, %v2919_v28 }
 0x24e   : > { %2260 = vmatpush3.bf16.xpose.msra.mxu1 %v959_v46  ;;  %2261 = vmatprep.mubr.msk.bf16.mxu1 %vm2655_vm1, %v2654_v9 }
 0x24f   : > { %2271 = vmatprep.subr.bf16.mxu1 %v2654_v9 }
 0x251   : > { %2256 = vmatmul.mubr.msk.bf16.vlgmr.msra.gmra.mrb[12].mxu0 %vm660_vm3, %v2917_v27 }
 0x252   : > { %2266 = vmatpush3.bf16.xpose.msra.mxu0 %v1008_v47  ;;  %2267 = vmatprep.mubr.msk.bf16.mxu0 %vm2655_vm1, %v2654_v9 }
 0x253   : > { %2277 = vmatprep.subr.bf16.mxu0 %v2654_v9 }
 0x255   : > { %2262 = vmatmul.mubr.msk.bf16.vlgmr.msra.gmra.mrb[12].mxu1 %vm660_vm3, %v2923_v31 }
 0x256   : > { %2272 = vmatpush3.bf16.msra.mxu1 %v1153_v49  ;;  %2273 = vmatprep.mubr.msk.bf16.mxu1 %vm2655_vm1, %v2654_v9 }
 0x257   : > { %2283 = vmatprep.subr.bf16.mxu1 %v2654_v9 }
 0x259   : > { %2268 = vmatmul.mubr.msk.bf16.vlgmr.msra.gmra.mrb[16].mxu0 %vm660_vm3, %v2925_v32 }
 0x25a   : > { %2279 = vmatprep.mubr.msk.bf16.mxu0 %vm2655_vm1, %v2654_v9 }
 0x2ab   : > { %v701_v51 = vpop.f32.mrb[0].mxu1 }
 0x2ac   : > { %v702_v52 = vadd.f32 %v701_v51, %v656_v50  ;;  %v2227_v53 = vpop.f32.mrb[1].mxu1 }
 0x2ad   : > { %v704_v54 = vpop.f32.mrb[2].mxu1 }
 0x2ae   : > { %v2228_v55 = vpop.f32.mrb[3].mxu1  ;;  %v1050_v56 = vsel %vm660_vm3, %v702_v52, -inf }
 0x2af   : > { %1051 = vmax.xlane.f32.xlu0 %v1050_v56 }
 0x314   : > { %v750_v57 = vpop.f32.mrb[4].mxu0 }
 0x315   : > { %v751_v58 = vadd.f32 %v750_v57, %v656_v50  ;;  %v2233_v59 = vpop.f32.mrb[5].mxu0 }
 0x316   : > { %v753_v60 = vpop.f32.mrb[6].mxu0 }
 0x317   : > { %v2234_v61 = vpop.f32.mrb[7].mxu0  ;;  %v1053_v62 = vsel %vm660_vm3, %v751_v58, -inf }
 0x318   : > { %v799_v63 = vpop.f32.mrb[4].mxu1  ;;  %1054 = vmax.xlane.f32.xlu1 %v1053_v62 }
 0x319   : > { %v800_v0 = vadd.f32 %v799_v63, %v656_v50  ;;  %v2239_v1 = vpop.f32.mrb[5].mxu1 }
 0x31a   : > { %v802_v2 = vpop.f32.mrb[6].mxu1 }
 0x31b   : > { %v2240_v3 = vpop.f32.mrb[7].mxu1  ;;  %v1056_v4 = vsel %vm660_vm3, %v800_v0, -inf }
 0x31c   : > { %1057 = vmax.xlane.f32.xlu0 %v1056_v4  ;;  %v848_v5 = vpop.f32.mrb[8].mxu0 }
 0x31d   : > { %v849_v6 = vadd.f32 %v848_v5, %v656_v50  ;;  %v2245_v7 = vpop.f32.mrb[9].mxu0 }
 0x31e   : > { %v851_v8 = vpop.f32.mrb[10].mxu0 }
 0x31f   : > { %v2246_v10 = vpop.f32.mrb[11].mxu0  ;;  %v1059_v13 = vsel %vm660_vm3, %v849_v6, -inf }
 0x320   : > { %v897_v14 = vpop.f32.mrb[8].mxu1  ;;  %1060 = vmax.xlane.f32.xlu0 %v1059_v13 }
 0x321   : > { %v2983_v15 = vadd.f32 %v897_v14, %v656_v50  ;;  %v2251_v16 = vpop.f32.mrb[9].mxu1 }
 0x322   : > { %v900_v17 = vpop.f32.mrb[10].mxu1 }
 0x323   : > { %v2252_v18 = vpop.f32.mrb[11].mxu1  ;;  %v1062_v19 = vsel %vm660_vm3, %v2983_v15, -inf }
 0x324   : > { %1063 = vmax.xlane.f32.xlu1 %v1062_v19  ;;  %v946_v20 = vpop.f32.mrb[12].mxu0 }
 0x325   : > { %v2987_v22 = vadd.f32 %v946_v20, %v656_v50  ;;  %v2257_v23 = vpop.f32.mrb[13].mxu0 }
 0x326   : > { %v949_v26 = vpop.f32.mrb[14].mxu0 }
 0x327   : > { %v2258_v29 = vpop.f32.mrb[15].mxu0  ;;  %v1065_v30 = vsel %vm660_vm3, %v2987_v22, -inf }
 0x328   : > { %v995_v33 = vpop.f32.mrb[12].mxu1  ;;  %1066 = vmax.xlane.f32.xlu0 %v1065_v30 }
 0x329   : > { %v996_v34 = vadd.f32 %v995_v33, %v656_v50  ;;  %v2263_v35 = vpop.f32.mrb[13].mxu1 }
 0x32a   : > { %v998_v36 = vpop.f32.mrb[14].mxu1 }
 0x32b   : > { %v2264_v37 = vpop.f32.mrb[15].mxu1  ;;  %v1068_v38 = vsel %vm660_vm3, %v996_v34, -inf }
 0x32c   : > { %1069 = vmax.xlane.f32.xlu1 %v1068_v38  ;;  %v1044_v39 = vpop.f32.mrb[16].mxu0 }
 0x32d   : > { %v1045_v40 = vadd.f32 %v1044_v39, %v656_v50  ;;  %v2269_v41 = vpop.f32.mrb[17].mxu0 }
 0x32e   : > { %v1047_v42 = vpop.f32.mrb[18].mxu0 }
 0x32f   : > { %v2270_v43 = vpop.f32.mrb[19].mxu0  ;;  %v1071_v44 = vsel %vm660_vm3, %v1045_v40, -inf }
 0x330   : > { %1072 = vmax.xlane.f32.xlu0 %v1071_v44 }
 0x33c   : > { %v1052_v45 = vpop.xlane.xlu0 %1051 }
 0x33d   : > { %1243 = vrot.lane.b32.xlu1 %v2913_v25, %s2660_s29  ;;  %v1074_v46 = vsub.f32 %v702_v52, %v1052_v45 }
 0x33f   : > { %v1082_v47 = vmul.f32 1.442695, %v1074_v46 }
 0x341   : > { %1291 = vrot.lane.b32.xlu1 %v2911_v24, %s2660_s29  ;;  %2459 = vpow2.f32 %v1082_v47 }
 0x346   : > { %1195 = vrot.lane.b32.xlu0 %v2908_v21, %s2660_s29 }
 0x34b   : > { %v2999_v48 = vpop.eup %2459 }
 0x34c   : > { %v1098_v49 = vsel %vm660_vm3, %v2999_v48, 0.0 }
 0x365   : > { %1099 = vadd.xlane.f32.xlu1 %v1098_v49 }
 0x3a5   : > { %v1055_v50 = vpop.xlane.xlu1 %1054 }
 0x3a6   : > { %v1075_v51 = vsub.f32 %v751_v58, %v1055_v50 }
 0x3a8   : > { %v1084_v53 = vmul.f32 1.442695, %v1075_v51 }
 0x3a9   : > { %v1058_v25 = vpop.xlane.xlu0 %1057 }
 0x3aa   : > { %2461 = vpow2.f32 %v1084_v53  ;;  %v1076_v54 = vsub.f32 %v800_v0, %v1058_v25 }
 0x3ac   : > { %v1086_v24 = vmul.f32 1.442695, %v1076_v54 }
 0x3ad   : > { %v1061_v55 = vpop.xlane.xlu0 %1060 }
 0x3ae   : > { %2463 = vpow2.f32 %v1086_v24  ;;  %v1077_v21 = vsub.f32 %v849_v6, %v1061_v55 }
 0x3b0   : > { %v1088_v56 = vmul.f32 1.442695, %v1077_v21 }
 0x3b1   : > { %v1064_v2 = vpop.xlane.xlu1 %1063 }
 0x3b2   : > { %2465 = vpow2.f32 %v1088_v56  ;;  %v1078_v3 = vsub.f32 %v2983_v15, %v1064_v2 }
 0x3b4   : > { %v3003_v52 = vpop.eup %2461  ;;  %v1090_v6 = vmul.f32 1.442695, %v1078_v3 }
 0x3b5   : > { %v1101_v57 = vsel %vm660_vm3, %v3003_v52, 0.0  ;;  %v1067_v60 = vpop.xlane.xlu0 %1066 }
 0x3b6   : > { %1102 = vadd.xlane.f32.xlu0 %v1101_v57  ;;  %v1079_v5 = vsub.f32 %v2987_v22, %v1067_v60  ;;  %2467 = vpow2.f32 %v1090_v6 }
 0x3b8   : > { %v3007_v59 = vpop.eup %2463  ;;  %v1092_v8 = vmul.f32 1.442695, %v1079_v5 }
 0x3b9   : > { %v1104_v58 = vsel %vm660_vm3, %v3007_v59, 0.0  ;;  %v1070_v4 = vpop.xlane.xlu1 %1069 }
 0x3ba   : > { %1105 = vadd.xlane.f32.xlu1 %v1104_v58  ;;  %v1080_v7 = vsub.f32 %v996_v34, %v1070_v4  ;;  %2469 = vpow2.f32 %v1092_v8 }
 0x3bc   : > { %v3011_v61 = vpop.eup %2465  ;;  %v1094_v10 = vmul.f32 1.442695, %v1080_v7 }
 0x3bd   : > { %v1073_v62 = vpop.xlane.xlu0 %1072  ;;  %v1107_v63 = vsel %vm660_vm3, %v3011_v61, 0.0  ;;  %v1244_v16 = vpop.permute.xlu1 %1243 }
 0x3be   : > { %1108 = vadd.xlane.f32.xlu0 %v1107_v63  ;;  %v1081_v13 = vsub.f32 %v1045_v40, %v1073_v62  ;;  %2471 = vpow2.f32 %v1094_v10  ;;  %v1249_v34 = vsel %vm1151_vm4, %v1244_v16, 0 }
 0x3c0   : > { %v1096_v14 = vmul.f32 1.442695, %v1081_v13 }
 0x3c1   : > { %v1196_v0 = vpop.permute.xlu0 %1195  ;;  %v1292_v17 = vpop.permute.xlu1 %1291 }
 0x3c2   : > { %v1201_v1 = vsel %vm1151_vm4, %v1196_v0, 0  ;;  %2473 = vpow2.f32 %v1096_v14  ;;  %v1297_v42 = vsel %vm1151_vm4, %v1292_v17, 0 }
 0x3c3   : > { %2278 = vmatpush3.bf16.msra.mxu0 %v1201_v1 }
 0x3c4   : > { %2289 = vmatprep.subr.bf16.mxu0 %v2654_v9 }
 0x3cb   : > { %1387 = vrot.lane.b32.xlu1 %v2917_v27, %s2660_s29  ;;  %v3023_v27 = vpop.eup %2467 }
 0x3cc   : > { %v1110_v15 = vsel %vm660_vm3, %v3023_v27, 0.0 }
 0x3d4   : > { %1339 = vrot.lane.b32.xlu0 %v2919_v28, %s2660_s29  ;;  %v3025_v28 = vpop.eup %2469 }
 0x3d5   : > { %v3029_v18 = vpop.eup %2471  ;;  %v1113_v22 = vsel %vm660_vm3, %v3025_v28, 0.0 }
 0x3d6   : > { %v1116_v20 = vsel %vm660_vm3, %v3029_v18, 0.0  ;;  %v3035_v23 = vpop.eup %2473 }
 0x3d7   : > { %v1119_v26 = vsel %vm660_vm3, %v3035_v23, 0.0 }
 0x3ef   : > { %1111 = vadd.xlane.f32.xlu1 %v1110_v15 }
 0x3f2   : > { %v1100_v19 = vpop.xlane.xlu1 %1099 }
 0x3f3   : > { %2475 = vrcp.f32 %v1100_v19  ;;  %1117 = vadd.xlane.f32.xlu1 %v1116_v20  ;;  %1114 = vadd.xlane.f32.xlu0 %v1113_v22  ;;  %v2451_v22 = vld [vmem:[%s2862_s23] sm:$0xff]  }
 0x3f7   : > { %1120 = vadd.xlane.f32.xlu0 %v1119_v26 }
 0x3fd   : > { %v2476_v29 = vpop.eup %2475 }
 0x3fe   : > { %v1130_v30 = vmul.f32 %v2476_v29, %v2999_v48 }
 0x400   : > { %v1138_v33 = vpack.c.bf16 %v1130_v30, %v1130_v30  ;;  %v2452_v30 = vld [vmem:[%s2862_s23 + $0x8] sm:$0xff]   ;;  %s2663_s23 = smov 24  }
 0x402   : > { %2274 = vmatmul.mubr.msk.bf16.vlgmr.msra.gmra.mrb[16].mxu1 %vm660_vm3, %v1138_v33 }
 0x403   : > { %2284 = vmatpush3.bf16.msra.mxu1 %v1249_v34  ;;  %2285 = vmatprep.mubr.msk.bf16.mxu1 %vm2655_vm1, %v2654_v9 }
 0x404   : > { %1483 = vrot.lane.b32.xlu1 %v2925_v32, %s2660_s29  ;;  %2295 = vmatprep.subr.bf16.mxu1 %v2654_v9 }
 0x40d   : > { %1435 = vrot.lane.b32.xlu0 %v2923_v31, %s2660_s29 }
 0x443   : > { %v1103_v35 = vpop.xlane.xlu0 %1102 }
 0x444   : > { %2477 = vrcp.f32 %v1103_v35 }
 0x447   : > { %v1106_v36 = vpop.xlane.xlu1 %1105 }
 0x448   : > { %2479 = vrcp.f32 %v1106_v36 }
 0x44b   : > { %v1109_v37 = vpop.xlane.xlu0 %1108  ;;  %v1388_v47 = vpop.permute.xlu1 %1387 }
 0x44c   : > { %2481 = vrcp.f32 %v1109_v37  ;;  %v1393_v49 = vsel %vm1151_vm4, %v1388_v47, 0 }
 0x44e   : > { %v2478_v38 = vpop.eup %2477 }
 0x44f   : > { %v1131_v39 = vmul.f32 %v2478_v38, %v3003_v52  ;;  %v1340_v43 = vpop.permute.xlu0 %1339 }
 0x450   : > { %v1345_v46 = vsel %vm1151_vm4, %v1340_v43, 0 }
 0x451   : > { %v1139_v40 = vpack.c.bf16 %v1131_v39, %v1131_v39 }
 0x452   : > { %v2480_v41 = vpop.eup %2479 }
 0x453   : > { %v1132_v32 = vmul.f32 %v2480_v41, %v3007_v59  ;;  %2280 = vmatmul.mubr.msk.bf16.vlgmr.msra.gmra.mrb[20].mxu0 %vm660_vm3, %v1139_v40 }
 0x454   : > { %2290 = vmatpush3.bf16.msra.mxu0 %v1297_v42  ;;  %2291 = vmatprep.mubr.msk.bf16.mxu0 %vm2655_vm1, %v2654_v9 }
 0x455   : > { %v1140_v31 = vpack.c.bf16 %v1132_v32, %v1132_v32  ;;  %2301 = vmatprep.subr.bf16.mxu0 %v2654_v9 }
 0x456   : > { %v2482_v44 = vpop.eup %2481 }
 0x457   : > { %v1133_v45 = vmul.f32 %v2482_v44, %v3011_v61  ;;  %2286 = vmatmul.mubr.msk.bf16.vlgmr.msra.gmra.mrb[20].mxu1 %vm660_vm3, %v1140_v31 }
 0x458   : > { %2296 = vmatpush3.bf16.msra.mxu1 %v1345_v46  ;;  %2297 = vmatprep.mubr.msk.bf16.mxu1 %vm2655_vm1, %v2654_v9 }
 0x459   : > { %v1141_v48 = vpack.c.bf16 %v1133_v45, %v1133_v45  ;;  %2307 = vmatprep.subr.bf16.mxu1 %v2654_v9 }
 0x45b   : > { %2292 = vmatmul.mubr.msk.bf16.vlgmr.msra.gmra.mrb[24].mxu0 %vm660_vm3, %v1141_v48 }
 0x45c   : > { %2302 = vmatpush3.bf16.msra.mxu0 %v1393_v49  ;;  %2303 = vmatprep.mubr.msk.bf16.mxu0 %vm2655_vm1, %v2654_v9 }
 0x45d   : > { %2313 = vmatprep.subr.bf16.mxu0 %v2654_v9 }
 0x47c   : > { %v1112_v50 = vpop.xlane.xlu1 %1111 }
 0x47d   : > { %2483 = vrcp.f32 %v1112_v50 }
 0x480   : > { %v1118_v51 = vpop.xlane.xlu1 %1117  ;;  %v1115_v53 = vpop.xlane.xlu0 %1114 }
 0x481   : > { %2485 = vrcp.f32 %v1118_v51 }
 0x482   : > { %2487 = vrcp.f32 %v1115_v53 }
 0x484   : > { %v1121_v25 = vpop.xlane.xlu0 %1120  ;;  %v1484_v58 = vpop.permute.xlu1 %1483 }
 0x485   : > { %2489 = vrcp.f32 %v1121_v25  ;;  %v1489_v63 = vsel %vm1151_vm4, %v1484_v58, 0 }
 0x487   : > { %v2484_v54 = vpop.eup %2483 }
 0x488   : > { %v1134_v24 = vmul.f32 %v2484_v54, %v3023_v27  ;;  %v1436_v55 = vpop.permute.xlu0 %1435 }
 0x489   : > { %v1441_v57 = vsel %vm1151_vm4, %v1436_v55, 0 }
 0x48a   : > { %v1142_v21 = vpack.c.bf16 %v1134_v24, %v1134_v24 }
 0x48b   : > { %v2486_v56 = vpop.eup %2485 }
 0x48c   : > { %v2488_v52 = vpop.eup %2487  ;;  %2298 = vmatmul.mubr.msk.bf16.vlgmr.msra.gmra.mrb[24].mxu1 %vm660_vm3, %v1142_v21  ;;  %v1136_v60 = vmul.f32 %v2486_v56, %v3029_v18 }
 0x48d   : > { %v1135_v59 = vmul.f32 %v2488_v52, %v3025_v28  ;;  %2308 = vmatpush3.bf16.msra.mxu1 %v1441_v57  ;;  %2309 = vmatprep.mubr.msk.bf16.mxu1 %vm2655_vm1, %v2654_v9 }
 0x48e   : > { %2319 = vmatprep.subr.bf16.mxu1 %v2654_v9  ;;  %v1144_v0 = vpack.c.bf16 %v1136_v60, %v1136_v60  ;;  %v1568_v60 = vlaneseq }
 0x48f   : > { %v1143_v61 = vpack.c.bf16 %v1135_v59, %v1135_v59  ;;  %v2490_v62 = vpop.eup %2489 }
 0x490   : > { %v1137_v1 = vmul.f32 %v2490_v62, %v3035_v23  ;;  %v3097_v58 = vshrl.u32 %v1568_v60, 7  ;;  %v3101_v62 = vld [vmem:[%s2882_s13] sm:$0x3f] }
 0x491   : > { %2304 = vmatmul.mubr.msk.bf16.vlgmr.msra.gmra.mrb[28].mxu0 %vm660_vm3, %v1143_v61 }
 0x492   : > { %2314 = vmatpush3.bf16.msra.mxu0 %v1489_v63  ;;  %2315 = vmatprep.mubr.msk.bf16.mxu0 %vm2655_vm1, %v2654_v9  ;;  %v1145_v2 = vpack.c.bf16 %v1137_v1, %v1137_v1  ;;  %v1570_v61 = vsub.s32 0, %v3097_v58 }
 0x493   : > { %2327 = vmatprep.subr.bf16.mxu0 %v2654_v9 }
 0x494   : > { %2310 = vmatmul.mubr.msk.bf16.vlgmr.msra.gmra.mrb[28].mxu1 %vm660_vm3, %v1144_v0  ;;  %v1571_v63 = vrot.slane %v3101_v62, %v1570_v61 }
 0x495   : > { %2323 = vmatprep.mubr.msk.bf16.mxu1 %vm2655_vm1, %v2654_v9  ;;  %2320 = vmatpush3.bf16.msra.mxu1 %v2451_v22  ;;  %v2455_v22 = vld [vmem:[%s2872_s27] sm:$0xff]  }
 0x496   : > { %2321 = vmatprep.subr.bf16.mxu1 %v2654_v9 }
 0x499   : > { %2316 = vmatmul.mubr.msk.bf16.vlgmr.msra.gmra.mrb[32].mxu0 %vm660_vm3, %v1145_v2  ;;  %2322 = vmatpush3.bf16.msra.mxu1 %v2452_v30 }
 0x49a   : > { %2331 = vmatprep.mubr.msk.bf16.mxu0 %vm2655_vm1, %v2654_v9  ;;  %2335 = vmatprep.subr.bf16.mxu1 %v2654_v9 }
 0x4d5   : > { %v1189_v3 = vpop.f32.mrb[16].mxu1 }
 0x4d6   : > { %v2275_v4 = vpop.f32.mrb[17].mxu1 }
 0x4d7   : > { %v1192_v5 = vpop.f32.mrb[18].mxu1 }
 0x4d8   : > { %v2276_v6 = vpop.f32.mrb[19].mxu1 }
 0x526   : > { %v1237_v7 = vpop.f32.mrb[20].mxu0 }
 0x527   : > { %v2281_v8 = vpop.f32.mrb[21].mxu0 }
 0x528   : > { %v1240_v10 = vpop.f32.mrb[22].mxu0 }
 0x529   : > { %v2282_v13 = vpop.f32.mrb[23].mxu0 }
 0x52a   : > { %v1285_v14 = vpop.f32.mrb[20].mxu1 }
 0x52b   : > { %v2287_v16 = vpop.f32.mrb[21].mxu1 }
 0x52c   : > { %v1288_v27 = vpop.f32.mrb[22].mxu1 }
 0x52d   : > { %v2288_v28 = vpop.f32.mrb[23].mxu1 }
 0x52e   : > { %v1333_v17 = vpop.f32.mrb[24].mxu0 }
 0x52f   : > { %v2293_v15 = vpop.f32.mrb[25].mxu0 }
 0x530   : > { %v1336_v18 = vpop.f32.mrb[26].mxu0 }
 0x531   : > { %v2294_v19 = vpop.f32.mrb[27].mxu0 }
 0x532   : > { %v2453_v19 = vld [vmem:[%s2867_s30] sm:$0xff]  }
 0x533   : > { %2328 = vmatpush3.bf16.msra.mxu0 %v2453_v19 }
 0x534   : > { %2329 = vmatprep.subr.bf16.mxu0 %v2654_v9 }
 0x55f   : > { %v1381_v20 = vpop.f32.mrb[24].mxu1 }
 0x560   : > { %v2299_v23 = vpop.f32.mrb[25].mxu1 }
 0x561   : > { %v1384_v26 = vpop.f32.mrb[26].mxu1  ;;  %v2456_v23 = vld [vmem:[%s2872_s27 + $0x8] sm:$0xff]  }
 0x562   : > { %v2300_v29 = vpop.f32.mrb[27].mxu1 }
 0x564   : > { %v1429_v33 = vpop.f32.mrb[28].mxu0 }
 0x565   : > { %v2434_v34 = vpack.i.bf16 %v1429_v33, %v1237_v7  ;;  %v2305_v35 = vpop.f32.mrb[29].mxu0 }
 0x566   : > { %v1432_v36 = vpop.f32.mrb[30].mxu0 }
 0x567   : > { %2435 = vrot.lane.b32.xlu0 %v2434_v34, %s2661_s18  ;;  %v2306_v37 = vpop.f32.mrb[31].mxu0  ;;  %v1477_v38 = vpop.f32.mrb[28].mxu1  ;;  %v1659_v36 = vsub.s32 1, %v3097_v58 }
 0x568   : > { %v2439_v39 = vpack.i.bf16 %v1477_v38, %v1285_v14  ;;  %v2311_v40 = vpop.f32.mrb[29].mxu1  ;;  %v1665_v38 = vsub.s32 2, %v3097_v58 }
 0x569   : > { %v1480_v41 = vpop.f32.mrb[30].mxu1  ;;  %v1660_v37 = vrot.slane %v3101_v62, %v1659_v36 }
 0x56a   : > { %2440 = vrot.lane.b32.xlu1 %v2439_v39, %s2662_s22  ;;  %v2312_v42 = vpop.f32.mrb[31].mxu1 }
 0x56c   : > { %v1525_v32 = vpop.f32.mrb[32].mxu0 }
 0x56d   : > { %v2444_v43 = vpack.i.bf16 %v1525_v32, %v1333_v17  ;;  %v2317_v31 = vpop.f32.mrb[33].mxu0 }
 0x56e   : > { %v1528_v44 = vpop.f32.mrb[34].mxu0 }
 0x56f   : > { %2445 = vrot.lane.b32.xlu0 %v2444_v43, %s2663_s23  ;;  %v2318_v45 = vpop.f32.mrb[35].mxu0  ;;  %v1666_v43 = vrot.slane %v3101_v62, %v1665_v38 }
 0x5d9   : > { %v2436_v46 = vpop.permute.xlu0 %2435 }
 0x5da   : > { %v2438_v48 = vunpack.i.h.bf16 %v2436_v46  ;;  %v2437_v49 = vunpack.i.l.bf16 %v2436_v46 }
 0x5dc   : > { %v2441_v47 = vpop.permute.xlu1 %2440  ;;  %v1560_v25 = vsel %vm660_vm3, %v1381_v20, %v2438_v48  ;;  %v1543_v54 = vsel %vm660_vm3, %v1189_v3, %v2437_v49  ;;  %v2454_v20 = vld [vmem:[%s2867_s30 + $0x8] sm:$0xff]   ;;  %v2458_v48 = vld [vmem:[%s2872_s27 + $0x18] sm:$0xff]   ;;  %v2144_v49 = vld [vmem:[%s544_s16] ss:$0 sm:$0xff] }
 0x5dd   : > { %v2443_v50 = vunpack.i.h.bf16 %v2441_v47  ;;  %v2442_v51 = vunpack.i.l.bf16 %v2441_v47  ;;  %2330 = vmatpush3.bf16.msra.mxu0 %v2454_v20  ;;  %v2457_v47 = vld [vmem:[%s2872_s27 + $0x10] sm:$0xff]   ;;  %v1850_v20 = vsub.s32 4, %v3097_v58 }
 0x5df   : > { %v1545_v21 = vsel %vm1544_vm5, %v1543_v54, %v2442_v51  ;;  %v1561_v56 = vsel %vm1544_vm5, %v1560_v25, %v2443_v50 }
 0x5e1   : > { %v2446_v53 = vpop.permute.xlu0 %2445 }
 0x5e2   : > { %v2448_v24 = vunpack.i.h.bf16 %v2446_v53  ;;  %v2447_v55 = vunpack.i.l.bf16 %v2446_v53 }
 0x5e4   : > { %v1562_v52 = vsel %vm1546_vm6, %v1561_v56, %v2448_v24  ;;  %v1547_v57 = vsel %vm1546_vm6, %v1545_v21, %v2447_v55 }
 0x5e5   : > { %v1563_v59 = vpack.c.bf16 %v1562_v52, %v1547_v57 }
 0x5e7   : > { %2324 = vmatmul.mubr.msk.bf16.vlgmr.msra.gmra.mrb[32].mxu1 %vm583_vm2, %v1563_v59 }
 0x5e8   : > { %2343 = vmatprep.mubr.msk.bf16.mxu1 %vm2655_vm1, %v2654_v9  ;;  %2336 = vmatpush3.bf16.msra.mxu1 %v2455_v22  ;;  %v1856_v22 = vsub.s32 5, %v3097_v58 }
 0x5e9   : > { %2337 = vmatprep.subr.bf16.mxu1 %v2654_v9 }
 0x5ec   : > { %2338 = vmatpush3.bf16.msra.mxu1 %v2456_v23  ;;  %v1851_v23 = vrot.slane %v3101_v62, %v1850_v20 }
 0x5ed   : > { %2339 = vmatprep.subr.bf16.mxu1 %v2654_v9 }
 0x5f0   : > { %2340 = vmatpush3.bf16.msra.mxu1 %v2457_v47 }
 0x5f1   : > { %2341 = vmatprep.subr.bf16.mxu1 %v2654_v9  ;;  %v1749_v9 = vsub.s32 3, %v3097_v58  ;;  %v2499_v58 = vld [vmem:[#allocation8] sm:$0xff] (!%p2153_p6)  }
 0x5f3   : > { %v1750_v52 = vrot.slane %v3101_v62, %v1749_v9 }
 0x5f4   : > { %2342 = vmatpush3.bf16.msra.mxu1 %v2458_v48 }
 0x6ba   : > { %v1621_v0 = vpop.f32.mrb[32].mxu1 }
 0x6bb   : > { %v1622_v1 = vadd.f32 %v1621_v0, %v1571_v63  ;;  %v2325_v2 = vpop.f32.mrb[33].mxu1 }
 0x6bc   : > { %v1624_v3 = vpop.f32.mrb[34].mxu1 }
 0x6bd   : > { %v1625_v4 = vadd.f32 %v1624_v3, %v1571_v63  ;;  %v2326_v5 = vpop.f32.mrb[35].mxu1  ;;  %v1628_v6 = vadd.f32 %v1622_v1, %v2895_v11 }
 0x6bf   : > { %v1630_v7 = vsel %vm583_vm2, %v1628_v6, 0.0  ;;  %v1629_v8 = vadd.f32 %v1625_v4, %v2897_v12 }
 0x6c0   : > { %1631 = vadd.xlane.f32.xlu1 %v1630_v7 }
 0x6c1   : > { %v1633_v10 = vsel %vm583_vm2, %v1629_v8, 0.0 }
 0x6c2   : > { %1634 = vadd.xlane.f32.xlu0 %v1633_v10 }
 0x74d   : > { %v1632_v13 = vpop.xlane.xlu1 %1631 }
 0x74e   : > { %v1637_v14 = vmul.f32 0.03125, %v1632_v13 }
 0x74f   : > { %v1635_v16 = vpop.xlane.xlu0 %1634 }
 0x750   : > { %v1639_v27 = vsub.f32 %v1628_v6, %v1637_v14  ;;  %v1638_v28 = vmul.f32 0.03125, %v1635_v16 }
 0x752   : > { %v1640_v17 = vsub.f32 %v1629_v8, %v1638_v28  ;;  %v1641_v15 = vmul.f32 %v1639_v27, %v1639_v27 }
 0x754   : > { %v1643_v11 = vsel %vm583_vm2, %v1641_v15, 0.0  ;;  %v1642_v18 = vmul.f32 %v1640_v17, %v1640_v17 }
 0x755   : > { %1644 = vadd.xlane.f32.xlu0 %v1643_v11 }
 0x756   : > { %v1646_v12 = vsel %vm583_vm2, %v1642_v18, 0.0 }
 0x757   : > { %1647 = vadd.xlane.f32.xlu1 %v1646_v12 }
 0x7e2   : > { %v1645_v26 = vpop.xlane.xlu0 %1644 }
 0x7e3   : > { %v1649_v29 = vmul.f32 0.03125, %v1645_v26 }
 0x7e4   : > { %v1648_v30 = vpop.xlane.xlu1 %1647 }
 0x7e5   : > { %v1651_v33 = vadd.f32 1e-05, %v1649_v29  ;;  %v1650_v34 = vmul.f32 0.03125, %v1648_v30  ;;  %v1857_v29 = vrot.slane %v3101_v62, %v1856_v22 }
 0x7e7   : > { %2491 = vrsqrt.f32 %v1651_v33  ;;  %v1652_v35 = vadd.f32 1e-05, %v1650_v34 }
 0x7e9   : > { %2493 = vrsqrt.f32 %v1652_v35 }
 0x7f1   : > { %v2492_v39 = vpop.eup %2491 }
 0x7f2   : > { %v1655_v40 = vmul.f32 %v2492_v39, %v1639_v27  ;;  %v2664_v39 = vmov (!%p2153_p6), 0.0  }
 0x7f3   : > { %v2494_v41 = vpop.eup %2493  ;;  %2347 = vmatprep.subr.bf16.mxu0 (!%p2153_p6), %v2664_v39 }
 0x7f4   : > { %v1661_v42 = vmul.f32 %v1660_v37, %v1655_v40  ;;  %v1656_v32 = vmul.f32 %v2494_v41, %v1640_v17  ;;  %v2500_v40 = vld [vmem:[#allocation8 + $0x8] sm:$0xff] (!%p2153_p6)   ;;  %v2154_v41 = vld [vmem:[%s3195_s10] ss:$0 sm:$0xff] (!%p2153_p6) }
 0x7f6   : > { %v1662_v31 = vmul.f32 %v1660_v37, %v1656_v32  ;;  %v1667_v44 = vadd.f32 %v1666_v43, %v1661_v42 }
 0x7f8   : > { %v1668_v45 = vadd.f32 %v1666_v43, %v1662_v31 }
 0x7fa   : > { %v1669_v46 = vpack.c.bf16 %v1668_v45, %v1667_v44 }
 0x7fc   : > { %2332 = vmatmul.mubr.msk.bf16.vlgmr.msra.gmra.mrb[36].mxu0 %vm583_vm2, %v1669_v46 }
 0x7fd   : > { %2348 = vmatpush3.bf16.msra.mxu0 (!%p2153_p6), %v2499_v58  ;;  %2351 = vmatprep.mubr.msk.bf16.mxu0 (!%p2153_p6), %vm2665_vm8, %v2664_v39 }
 0x7fe   : > { %2349 = vmatprep.subr.bf16.mxu0 (!%p2153_p6), %v2664_v39 }
 0x801   : > { %2350 = vmatpush3.bf16.msra.mxu0 (!%p2153_p6), %v2500_v40 }
 0x8cf   : > { %v1729_v50 = vpop.f32.mrb[36].mxu0 }
 0x8d0   : > { %v1730_v51 = vadd.f32 %v2144_v49, %v1729_v50  ;;  %v2333_v53 = vpop.f32.mrb[37].mxu0 }
 0x8d1   : > { %v1732_v25 = vpop.f32.mrb[38].mxu0 }
 0x8d2   : > { %v1733_v54 = vadd.f32 %v2144_v49, %v1732_v25  ;;  %v2334_v24 = vpop.f32.mrb[39].mxu0  ;;  %v1736_v55 = vmax.f32 %v1730_v51, 0.0 }
 0x8d4   : > { %v1737_v21 = vmax.f32 %v1733_v54, 0.0 }
 0x8d6   : > { %v1738_v56 = vpack.c.bf16 %v1737_v21, %v1736_v55 }
 0x8d8   : > { %2344 = vmatmul.mubr.msk.bf16.vlgmr.msra.gmra.mrb[36].mxu1 %vm1775_vm7, %v1738_v56 }
 0x9ab   : > { %v1813_v57 = vpop.f32.mrb[36].mxu1 }
 0x9ac   : > { %v1814_v59 = vadd.f32 %v1813_v57, %v1750_v52  ;;  %v2345_v60 = vpop.f32.mrb[37].mxu1 }
 0x9ad   : > { %v1816_v61 = vpop.f32.mrb[38].mxu1 }
 0x9ae   : > { %v1817_v63 = vadd.f32 %v1816_v61, %v1750_v52  ;;  %v2346_v0 = vpop.f32.mrb[39].mxu1  ;;  %v1820_v1 = vadd.f32 %v1814_v59, %v1667_v44 }
 0x9b0   : > { %v1822_v2 = vsel %vm583_vm2, %v1820_v1, 0.0  ;;  %v1821_v3 = vadd.f32 %v1817_v63, %v1668_v45 }
 0x9b1   : > { %1823 = vadd.xlane.f32.xlu0 %v1822_v2 }
 0x9b2   : > { %v1825_v4 = vsel %vm583_vm2, %v1821_v3, 0.0 }
 0x9b3   : > { %1826 = vadd.xlane.f32.xlu1 %v1825_v4 }
 0xa3e   : > { %v1824_v5 = vpop.xlane.xlu0 %1823 }
 0xa3f   : > { %v1828_v6 = vmul.f32 0.03125, %v1824_v5 }
 0xa40   : > { %v1827_v7 = vpop.xlane.xlu1 %1826 }
 0xa41   : > { %v1830_v8 = vsub.f32 %v1820_v1, %v1828_v6  ;;  %v1829_v10 = vmul.f32 0.03125, %v1827_v7 }
 0xa43   : > { %v1831_v13 = vsub.f32 %v1821_v3, %v1829_v10  ;;  %v1832_v14 = vmul.f32 %v1830_v8, %v1830_v8 }
 0xa45   : > { %v1834_v16 = vsel %vm583_vm2, %v1832_v14, 0.0  ;;  %v1833_v27 = vmul.f32 %v1831_v13, %v1831_v13 }
 0xa46   : > { %1835 = vadd.xlane.f32.xlu0 %v1834_v16 }
 0xa47   : > { %v1837_v28 = vsel %vm583_vm2, %v1833_v27, 0.0 }
 0xa48   : > { %1838 = vadd.xlane.f32.xlu1 %v1837_v28 }
 0xad3   : > { %v1836_v17 = vpop.xlane.xlu0 %1835 }
 0xad4   : > { %v1840_v15 = vmul.f32 0.03125, %v1836_v17 }
 0xad5   : > { %v1839_v11 = vpop.xlane.xlu1 %1838 }
 0xad6   : > { %v1842_v18 = vadd.f32 1e-05, %v1840_v15  ;;  %v1841_v12 = vmul.f32 0.03125, %v1839_v11 }
 0xad8   : > { %2495 = vrsqrt.f32 %v1842_v18  ;;  %v1843_v19 = vadd.f32 1e-05, %v1841_v12 }
 0xada   : > { %2497 = vrsqrt.f32 %v1843_v19 }
 0xae2   : > { %v2496_v26 = vpop.eup %2495 }
 0xae3   : > { %v1846_v30 = vmul.f32 %v2496_v26, %v1830_v8 }
 0xae4   : > { %v2498_v33 = vpop.eup %2497 }
 0xae5   : > { %v1852_v34 = vmul.f32 %v1851_v23, %v1846_v30  ;;  %v1847_v35 = vmul.f32 %v2498_v33, %v1831_v13  ;;  %1865 = sbr.rel (%p2153_p6) target bundleno = 3014 (0xbc6), region = 84 }
 0xae7   : > { %v1858_v36 = vadd.f32 %v1857_v29, %v1852_v34  ;;  %v1853_v37 = vmul.f32 %v1851_v23, %v1847_v35 }
 0xae9   : > { %1860 = vst.msk [vmem:[#allocation2] sm:$0xff] %vm583_vm2, %v1858_v36  ;;  %v1859_v38 = vadd.f32 %v1857_v29, %v1853_v37 }
 0xaeb   : > { %1861 = vst.msk [vmem:[#allocation2 + $0x8] sm:$0xff] %vm583_vm2, %v1859_v38  ;;  %v1866_v62 = vpack.c.bf16 (!%p2153_p6), %v1859_v38, %v1858_v36 }
 0xaed   : > { %2352 = vmatmul.mubr.msk.bf16.vlgmr.msra.gmra.mrb[0].mxu0 %vm583_vm2, %v1866_v62 }
 0xbc0   : > { %v1927_v42 = vpop.f32.mrb[0].mxu0 }
 0xbc1   : > { %v1928_v32 = vadd.f32 %v2154_v41, %v1927_v42  ;;  %v2353_v43 = vpop.f32.mrb[1].mxu0 }
 0xbc2   : > { %v1930_v31 = vpop.f32.mrb[2].mxu0 }
 0xbc3   : > { %1934 = vst [vmem:[#allocation9] sm:$0xff] %v1928_v32  ;;  %v1931_v44 = vadd.f32 %v2154_v41, %v1930_v31  ;;  %v2354_v45 = vpop.f32.mrb[3].mxu0 }
 0xbc5   : > { %1935 = vst [vmem:[#allocation9 + $0x8] sm:$0xff] %v1931_v44 }
 0xbc6 PF: > { %s3216_s17 = sadd.s32 4294967295, %s2645_s19   ;;  %s2666_s12 = smov [#allocation9]  }
 0xbc7   : > { %p3149_p9 = scmp.eq.s32.totalorder %s3216_s17, 1  ;;  %s1945_s13 = sshll.u32 %s2666_s12, 4  ;;  %s1946_s13 = int_to_ptr.vmem [resolvable:$true] %s1945_s13 }
 0xbc8   : > { %s2585_s24 = scalar_lea.vmem %s1946_s13, 256  ;;  %p2592_p13 = scmp.lt.s32.totalorder %s1946_s13, %s1946_s13 }
 0xbc9   : > { %p2586_p10 = scmp.ne.s32.totalorder %s1946_s13, %s2585_s24  ;;  %p2593_p0 = scmp.lt.s32.totalorder %s2585_s24, %s2585_s24 }
 0xbcb   : > { %p2587_p11 = pnand %p2586_p10, %p3149_p9  ;;  %p2594_p1 = por %p2593_p0, %p2592_p13 }
 0xbcd   : > { %p2588_p12 = pneg %p2587_p11 }
 0xbcf   : > { %p2595_p4 = pnand %p2594_p1, %p2588_p12 }
 0xbd1   : > { %2598 = shalt.err (!%p2595_p4)
}
 0xbd2   : > { %s2599_s20 = scalar_lea.hbm %s3196_s11, 256 }
 0xbd3   : > { %p2600_p7 = scmp.ne.s32.totalorder %s3196_s11, %s2599_s20  ;;  %p2605_p8 = scmp.lt.u32.totalorder %s2599_s20, %s3196_s11 }
 0xbd5   : > { %p2601_p2 = pnand %p2600_p7, %p3149_p9 }
 0xbd7   : > { %p2602_p3 = pneg %p2601_p2 }
 0xbd9   : > { %p2607_p5 = pnand %p2605_p8, %p2602_p3 }
 0xbdb   : > { %2610 = shalt.err (!%p2607_p5)
}
 0xbdc   : > { %s2667_s29 = smov 128  }
 0xbdd   : > { %2368 = dma.vmem_to_hbm [thread:$0]  (%p3149_p9), %s1946_s13, 256, %s3196_s11, [#allocation5], %s2667_s29, %s2667_s29, %s2661_s18  }
 0xbde   : > { %2632 = dma.done.wait (%p3149_p9), [#allocation5], 256  }
 0xbdf   : > { %2634 = vsyncadd (%p3149_p9), [#allocation5], 4294967040 }
 0xbe0 PF: > { %s24_s19 = sadd.s32 1, %s2645_s19   ;;  %s3218_s17 = sld [smem:[#allocation13_spill]] }
 0xbe1   : > { %p21_p6 = scmp.ge.s32.totalorder %s24_s19, 4   ;;  %s3219_s18 = sld [smem:[#allocation14_spill]] }
 0xbe3   :  { %23 = sbr.rel (!%p21_p6) target bundleno = 7 (0x7), region = 131 }
 0xbea   :  { %1961 = vsyncpa [#allocation4], 1 }
 0xbeb   :  { %1963 = vsyncpa [#allocation4 + $0x1], 1 }
 0xbec   :  { %1964 = vsyncpa [#allocation7], 1 }
 0xbed   :  { %1965 = vsyncpa [#allocation5], 1 }
 0xbee   :  { %1967 = vsyncpa [#allocation5 + $0x1], 1 }

</bundles_post_ra>
